<compile_context>
chip_gen: v7x
topology: tpu7x:2x2x1
jax: 0.10.0
libtpu: 0.0.40
codegen_flags: <defaults>
</compile_context>

<pallas_src>
import functools

import numpy as np

import jax
import jax.numpy as jnp
from jax.experimental import pallas as pl
from jax.experimental.pallas import tpu as pltpu


def _round_up(x, m):
    return (x + m - 1) // m * m


# ----------------------------------------------------------------------------
# One-time (per model) parameter layout transform — NOT on the per-step path.
# ----------------------------------------------------------------------------
def prepare_convlstm_params(w_oihw, bias, *, input_channels, hidden_channels,
                            kernel_size, width, dtype=jnp.bfloat16):
    """Convert PyTorch Conv2d params into a K-stacked banded matrix + bias row.

    The returned weight Wb has shape (K * Cc, 4*W*Ch) with
        Cc = W*Ch + round_up(W*Cx, 128)
    and maps, for vertical tap kh, one lane-dense padded activation row
    [h_cur | x | 0-pad] of width Cc to one lane-dense gate row (gate-major
    [i | f | g | o], each W*Ch wide).  'same' padding along W and the lane
    padding of x are folded in as zero rows, so the kernel never masks.
    Built once per model (fixed image width W); bf16 by default (MXU operands).
    """
    Cx, Ch, K, W = input_channels, hidden_channels, kernel_size, width
    Cin = Cx + Ch
    p = K // 2
    Wch, Wcx = W * Ch, W * Cx
    Wcx_pad = _round_up(Wcx, 128)          # lane-pad x so staging stores are full vregs
    Cc = Wch + Wcx_pad
    Nout = 4 * Wch

    # Lane-dense gates/state and 128-aligned gate slices require W*Ch % 128 == 0.
    assert Wch % 128 == 0, (
        f"W*hidden_channels={Wch} must be a multiple of 128 for lane-dense "
        "gate slices / outputs (pad hidden_channels or width).")

    w = np.asarray(w_oihw, dtype=np.float32)            # (4*Ch, Cin, K, K)
    assert w.shape == (4 * Ch, Cin, K, K)
    w_t = np.transpose(w, (2, 3, 1, 0))                  # (K, K, Cin, 4*Ch)

    wb = np.zeros((K, Cc, Nout), np.float32)
    for kh in range(K):
        for wo in range(W):                               # output spatial column
            for kw in range(K):
                wi = wo + kw - p                          # input spatial column
                if wi < 0 or wi >= W:
                    continue                              # 'same' pad along W -> zero tap
                blk = w_t[kh, kw]                         # (Cin, 4*Ch)
                for g in range(4):                        # gate order [i, f, g, o]
                    oc = slice(g * Wch + wo * Ch, g * Wch + (wo + 1) * Ch)
                    # rows [0, W*Ch): h_cur channels (conv in-channels Cx..Cin)
                    wb[kh, wi * Ch:(wi + 1) * Ch, oc] = blk[Cx:, g * Ch:(g + 1) * Ch]
                    # rows [W*Ch, W*Ch + W*Cx): x channels (conv in-channels 0..Cx)
                    wb[kh, Wch + wi * Cx:Wch + (wi + 1) * Cx, oc] = \
                        blk[:Cx, g * Ch:(g + 1) * Ch]
                    # rows [W*Ch + W*Cx, Cc) stay zero -> x lane padding is free.

    wb_stacked = np.ascontiguousarray(wb.reshape(K * Cc, Nout))

    b = np.asarray(bias, dtype=np.float32).reshape(4, 1, Ch)
    b_row = np.ascontiguousarray(
        np.broadcast_to(b, (4, W, Ch)).reshape(1, Nout))  # f32 bias, gate-major

    return jnp.asarray(wb_stacked, dtype=dtype), jnp.asarray(b_row, jnp.float32)


# ----------------------------------------------------------------------------
# Pallas kernel: one grid step = Bt batch elements, one MXU matmul.
# ----------------------------------------------------------------------------
def _convlstm_cell_kernel(x_ref, h_ref, c_ref, wb_ref, b_ref,
                          h_out_ref, c_out_ref, comb_ref,
                          *, Bt, H, Wch, Cc, K):
    """ConvLSTM cell step for a block of Bt batch elements.

    x_ref    : (Bt, H, Wcx_pad)   input, lane-dense, lane-padded to 128
    h_ref    : (Bt, H, Wch)       current hidden state, lane-dense
    c_ref    : (Bt, H, Wch)       current cell state, lane-dense
    wb_ref   : (K*Cc, 4*Wch)      K-stacked banded conv weights (bf16)
    b_ref    : (1, 4*Wch)         gate-major bias (f32)
    h_out_ref: (Bt, H, Wch)
    c_out_ref: (Bt, H, Wch)
    comb_ref : (Bt, H+K-1, Cc)    VMEM scratch: per-sample H-padded [h | x]
    """
    p = K // 2
    Hp = H + 2 * p
    cdt = comb_ref.dtype

    # --- Stage [h_cur | x] into the per-sample H-padded scratch (bf16). -----
    # Only the 2*p pad rows are zeroed; data rows are fully overwritten and
    # the x lane padding never needs clearing (matching weight rows are zero).
    if p:
        comb_ref[:, 0:p, :] = jnp.zeros((Bt, p, Cc), cdt)
        comb_ref[:, p + H:Hp, :] = jnp.zeros((Bt, p, Cc), cdt)
    comb_ref[:, p:p + H, 0:Wch] = h_ref[...].astype(cdt)
    comb_ref[:, p:p + H, Wch:Cc] = x_ref[...].astype(cdt)

    # --- im2col along H: lane-concat the K row-shifted views -> one matmul. -
    taps = [comb_ref[:, kh:kh + H, :] for kh in range(K)]
    lhs = jnp.concatenate(taps, axis=-1).reshape(Bt * H, K * Cc)   # (Bt*H, K*Cc)

    # Single bf16 MXU matmul, f32 accumulation, gates kept as a local value
    # (no VMEM accumulator scratch / no read-modify-write passes).
    gates = jnp.dot(lhs, wb_ref[...], preferred_element_type=jnp.float32)
    gates = gates + b_ref[...]                                      # f32 bias

    # Gate order matches PyTorch gates.chunk(4, dim=1): [i, f, g, o].
    # Slices are 128-lane aligned (Wch % 128 == 0).
    i_g = jax.nn.sigmoid(gates[:, 0 * Wch:1 * Wch])
    f_g = jax.nn.sigmoid(gates[:, 1 * Wch:2 * Wch])
    g_g = jnp.tanh(gates[:, 2 * Wch:3 * Wch])
    o_g = jax.nn.sigmoid(gates[:, 3 * Wch:4 * Wch])

    c_cur = c_ref[...].reshape(Bt * H, Wch).astype(jnp.float32)
    c_next = f_g * c_cur + i_g * g_g
    h_next = o_g * jnp.tanh(c_next)

    c_out_ref[...] = c_next.reshape(Bt, H, Wch).astype(c_out_ref.dtype)
    h_out_ref[...] = h_next.reshape(Bt, H, Wch).astype(h_out_ref.dtype)


# ----------------------------------------------------------------------------
# Lane-dense step (call this inside a recurrent scan; keep h/c lane-dense).
# ----------------------------------------------------------------------------
def conv_lstm_cell_step(x2, h2, c2, wb, b_row, *, kernel_size, block_batch=8):
    """One ConvLSTM cell step on lane-dense tensors.

    x2 : (B, H, Wcx_pad) f32   (x already lane-padded to a multiple of 128)
    h2 : (B, H, W*Ch)    f32
    c2 : (B, H, W*Ch)    f32
    Returns (h_next2, c_next2) in the same lane-dense layout.
    """
    B, H, Wcx_pad = x2.shape
    Wch = h2.shape[-1]
    K = kernel_size
    Cc = Wch + Wcx_pad
    Nout = 4 * Wch
    assert wb.shape == (K * Cc, Nout), (wb.shape, (K * Cc, Nout))
    assert b_row.shape == (1, Nout)

    # Largest batch block <= block_batch that divides B (keeps >=1 program;
    # pick block_batch so B/Bt stays even for v7x megacore sharding).
    Bt = max(1, min(block_batch, B))
    while B % Bt:
        Bt -= 1

    kernel = functools.partial(_convlstm_cell_kernel,
                               Bt=Bt, H=H, Wch=Wch, Cc=Cc, K=K)

    h_next2, c_next2 = pl.pallas_call(
        kernel,
        grid=(B // Bt,),
        in_specs=[
            pl.BlockSpec((Bt, H, Wcx_pad), lambda i: (i, 0, 0)),   # x
            pl.BlockSpec((Bt, H, Wch), lambda i: (i, 0, 0)),       # h_cur
            pl.BlockSpec((Bt, H, Wch), lambda i: (i, 0, 0)),       # c_cur
            pl.BlockSpec((K * Cc, Nout), lambda i: (0, 0)),        # stacked banded weights (constant)
            pl.BlockSpec((1, Nout), lambda i: (0, 0)),             # bias row (constant)
        ],
        out_specs=(
            pl.BlockSpec((Bt, H, Wch), lambda i: (i, 0, 0)),       # h_next
            pl.BlockSpec((Bt, H, Wch), lambda i: (i, 0, 0)),       # c_next
        ),
        out_shape=(
            jax.ShapeDtypeStruct((B, H, Wch), h2.dtype),
            jax.ShapeDtypeStruct((B, H, Wch), c2.dtype),
        ),
        scratch_shapes=[
            pltpu.VMEM((Bt, H + 2 * (K // 2), Cc), wb.dtype),      # padded [h|x] staging
        ],
        # Recurrent state updated in place: h_cur -> h_next, c_cur -> c_next.
        input_output_aliases={1: 0, 2: 1},
        compiler_params=pltpu.CompilerParams(
            dimension_semantics=("parallel",),   # shard batch blocks across TCs
            vmem_limit_bytes=32 * 1024 * 1024,   # fits v5e/v6e/v7x scoped limits
        ),
    )(x2, h2, c2, wb, b_row)

    return h_next2, c_next2


# ----------------------------------------------------------------------------
# Layout helpers + module-equivalent NCHW forward (conversions hoisted here;
# in a recurrent scan keep h/c and the pre-padded x sequence lane-dense).
# ----------------------------------------------------------------------------
def nchw_to_lanes(a_nchw, lane_width=None):
    B, C, H, W = a_nchw.shape
    a = jnp.transpose(a_nchw, (0, 2, 3, 1)).reshape(B, H, W * C)
    if lane_width is not None and lane_width > W * C:
        a = jnp.pad(a, ((0, 0), (0, 0), (0, lane_width - W * C)))
    return a


def lanes_to_nchw(a_lanes, channels):
    B, H, WC = a_lanes.shape
    W = WC // channels
    return jnp.transpose(a_lanes.reshape(B, H, W, channels), (0, 3, 1, 2))


def conv_lstm_cell_forward(x_nchw, hidden_state, wb, b_row, *,
                           input_channels, hidden_channels, kernel_size,
                           block_batch=8):
    """ConvLSTMCell.forward(x, (h_cur, c_cur)) -> (h_next, c_next), NCHW I/O."""
    h_cur, c_cur = hidden_state
    B, Cx, H, W = x_nchw.shape
    assert Cx == input_channels
    Wcx_pad = _round_up(W * Cx, 128)

    x2 = nchw_to_lanes(x_nchw, Wcx_pad)
    h2 = nchw_to_lanes(h_cur)
    c2 = nchw_to_lanes(c_cur)

    h_next2, c_next2 = conv_lstm_cell_step(
        x2, h2, c2, wb, b_row, kernel_size=kernel_size, block_batch=block_batch)

    return (lanes_to_nchw(h_next2, hidden_channels),
            lanes_to_nchw(c_next2, hidden_channels))


# ----------------------------------------------------------------------------
# Pure-JAX reference (PyTorch semantics) for verification.
# ----------------------------------------------------------------------------
def _reference(x, h, c, w_oihw, bias, *, operand_dtype=jnp.float32):
    combined = jnp.concatenate([x, h], axis=1).astype(operand_dtype)   # NCHW
    gates = jax.lax.conv_general_dilated(
        combined, w_oihw.astype(operand_dtype), window_strides=(1, 1),
        padding='SAME', dimension_numbers=('NCHW', 'OIHW', 'NCHW'),
        preferred_element_type=jnp.float32)
    gates = gates + bias.reshape(1, -1, 1, 1)
    i, f, g, o = jnp.split(gates, 4, axis=1)
    c_next = jax.nn.sigmoid(f) * c + jax.nn.sigmoid(i) * jnp.tanh(g)
    h_next = jax.nn.sigmoid(o) * jnp.tanh(c_next)
    return h_next, c_next


# ----------------------------------------------------------------------------
# Main
# ----------------------------------------------------------------------------
if __name__ == "__main__":
    B = 16           # batch (Bt=8 -> M=128 rows per matmul, 2 parallel programs)
    Cx = 4           # input_channels
    Ch = 8           # hidden_channels
    H = W = 16       # spatial (W*Ch = 128 -> lane-dense state/outputs)
    K = 3            # kernel_size
    Cin = Cx + Ch

    key = jax.random.PRNGKey(0)
    kx, kh, kc, kw, kb = jax.random.split(key, 5)

    x = jax.random.normal(kx, (B, Cx, H, W), jnp.float32)
    h_cur = jax.random.normal(kh, (B, Ch, H, W), jnp.float32)
    c_cur = jax.random.normal(kc, (B, Ch, H, W), jnp.float32)

    # PyTorch-default-like Conv2d init.
    fan_in = Cin * K * K
    bound = 1.0 / np.sqrt(fan_in)
    w = jax.random.uniform(kw, (4 * Ch, Cin, K, K), jnp.float32, -bound, bound)
    b = jax.random.uniform(kb, (4 * Ch,), jnp.float32, -bound, bound)

    # One-time per-model weight layout transform (bf16 MXU operands).
    wb, b_row = prepare_convlstm_params(
        w, b, input_channels=Cx, hidden_channels=Ch, kernel_size=K, width=W,
        dtype=jnp.bfloat16)

    fwd = jax.jit(functools.partial(
        conv_lstm_cell_forward, input_channels=Cx, hidden_channels=Ch,
        kernel_size=K, block_batch=8))

    h_next, c_next = fwd(x, (h_cur, c_cur), wb, b_row)
    jax.block_until_ready((h_next, c_next))

    assert h_next.shape == (B, Ch, H, W) and c_next.shape == (B, Ch, H, W)

    # Tight check against a reference with the same numerics (bf16 MXU
    # operands, f32 accumulation and gate math).
    h_r16, c_r16 = _reference(x, h_cur, c_cur, w, b, operand_dtype=jnp.bfloat16)
    np.testing.assert_allclose(np.asarray(h_next), np.asarray(h_r16),
                               rtol=2e-3, atol=2e-3)
    np.testing.assert_allclose(np.asarray(c_next), np.asarray(c_r16),
                               rtol=2e-3, atol=2e-3)

    # Loose sanity check against the pure-f32 PyTorch semantics (difference is
    # only the bf16 rounding of the MXU operands, as recommended by review).
    h_r32, c_r32 = _reference(x, h_cur, c_cur, w, b, operand_dtype=jnp.float32)
    np.testing.assert_allclose(np.asarray(h_next), np.asarray(h_r32),
                               rtol=2e-2, atol=2e-2)
    np.testing.assert_allclose(np.asarray(c_next), np.asarray(c_r32),
                               rtol=2e-2, atol=2e-2)

    print("KERNEL_OK")
</pallas_src>

<mosaic_0001>
module attributes {stable_mosaic.version = 11 : i64} {
  func.func @_convlstm_cell_kernel(%arg0: i32, %arg1: memref<8x16x128xf32, #tpu.memory_space<vmem>>, %arg2: memref<8x16x128xf32, #tpu.memory_space<vmem>>, %arg3: memref<8x16x128xf32, #tpu.memory_space<vmem>>, %arg4: memref<768x512xbf16, #tpu.memory_space<vmem>>, %arg5: memref<1x512xf32, #tpu.memory_space<vmem>>, %arg6: memref<8x16x128xf32, #tpu.memory_space<vmem>>, %arg7: memref<8x16x128xf32, #tpu.memory_space<vmem>>, %arg8: memref<8x18x256xbf16, #tpu.memory_space<vmem>>) attributes {dimension_semantics = [#tpu.dimension_semantics<parallel>], iteration_bounds = array<i64: 2>, scalar_prefetch = 0 : i64, scratch_operands = 1 : i64, tpu.core_type = #tpu.core_type<tc>, window_params = [{transform_indices = @transform_0, window_bounds = array<i64: 8, 16, 128>}, {transform_indices = @transform_1, window_bounds = array<i64: 8, 16, 128>}, {transform_indices = @transform_2, window_bounds = array<i64: 8, 16, 128>}, {pipeline_mode = #tpu.pipeline_mode<synchronous>, transform_indices = @transform_3, window_bounds = array<i64: 768, 512>}, {pipeline_mode = #tpu.pipeline_mode<synchronous>, transform_indices = @transform_4, window_bounds = array<i64: 1, 512>}, {transform_indices = @transform_5, window_bounds = array<i64: 8, 16, 128>}, {transform_indices = @transform_6, window_bounds = array<i64: 8, 16, 128>}]} {
    %cst = arith.constant 0.000000e+00 : bf16
    %0 = vector.broadcast %cst : bf16 to vector<8x1x256xbf16>
    %c0 = arith.constant 0 : index
    %c0_0 = arith.constant 0 : index
    %c0_1 = arith.constant 0 : index
    %1 = vector.load %arg8[%c0, %c0_0, %c0_1] : memref<8x18x256xbf16, #tpu.memory_space<vmem>>, vector<8x1x256xbf16>
    tpu.vector_store %arg8[%c0, %c0_0, %c0_1], %0 {strides = array<i32>} : memref<8x18x256xbf16, #tpu.memory_space<vmem>>, vector<8x1x256xbf16>,
    %cst_2 = arith.constant 0.000000e+00 : bf16
    %2 = vector.broadcast %cst_2 : bf16 to vector<8x1x256xbf16>
    %c0_3 = arith.constant 0 : index
    %c17 = arith.constant 17 : index
    %c0_4 = arith.constant 0 : index
    %3 = vector.load %arg8[%c0_3, %c17, %c0_4] : memref<8x18x256xbf16, #tpu.memory_space<vmem>>, vector<8x1x256xbf16>
    tpu.vector_store %arg8[%c0_3, %c17, %c0_4], %2 {strides = array<i32>} : memref<8x18x256xbf16, #tpu.memory_space<vmem>>, vector<8x1x256xbf16>,
    %c0_5 = arith.constant 0 : index
    %c0_6 = arith.constant 0 : index
    %c0_7 = arith.constant 0 : index
    %4 = vector.load %arg2[%c0_5, %c0_6, %c0_7] : memref<8x16x128xf32, #tpu.memory_space<vmem>>, vector<8x16x128xf32>
    %5 = arith.truncf %4 : vector<8x16x128xf32> to vector<8x16x128xbf16>
    %c0_8 = arith.constant 0 : index
    %c1 = arith.constant 1 : index
    %c0_9 = arith.constant 0 : index
    %6 = vector.load %arg8[%c0_8, %c1, %c0_9] : memref<8x18x256xbf16, #tpu.memory_space<vmem>>, vector<8x16x128xbf16>
    tpu.vector_store %arg8[%c0_8, %c1, %c0_9], %5 {strides = array<i32>} : memref<8x18x256xbf16, #tpu.memory_space<vmem>>, vector<8x16x128xbf16>,
    %c0_10 = arith.constant 0 : index
    %c0_11 = arith.constant 0 : index
    %c0_12 = arith.constant 0 : index
    %7 = vector.load %arg1[%c0_10, %c0_11, %c0_12] : memref<8x16x128xf32, #tpu.memory_space<vmem>>, vector<8x16x128xf32>
    %8 = arith.truncf %7 : vector<8x16x128xf32> to vector<8x16x128xbf16>
    %c0_13 = arith.constant 0 : index
    %c1_14 = arith.constant 1 : index
    %c128 = arith.constant 128 : index
    %9 = vector.load %arg8[%c0_13, %c1_14, %c128] : memref<8x18x256xbf16, #tpu.memory_space<vmem>>, vector<8x16x128xbf16>
    tpu.vector_store %arg8[%c0_13, %c1_14, %c128], %8 {strides = array<i32>} : memref<8x18x256xbf16, #tpu.memory_space<vmem>>, vector<8x16x128xbf16>,
    %c0_15 = arith.constant 0 : index
    %c0_16 = arith.constant 0 : index
    %c0_17 = arith.constant 0 : index
    %10 = vector.load %arg8[%c0_15, %c0_16, %c0_17] : memref<8x18x256xbf16, #tpu.memory_space<vmem>>, vector<8x16x256xbf16>
    %c0_18 = arith.constant 0 : index
    %c1_19 = arith.constant 1 : index
    %c0_20 = arith.constant 0 : index
    %11 = vector.load %arg8[%c0_18, %c1_19, %c0_20] : memref<8x18x256xbf16, #tpu.memory_space<vmem>>, vector<8x16x256xbf16>
    %c0_21 = arith.constant 0 : index
    %c2 = arith.constant 2 : index
    %c0_22 = arith.constant 0 : index
    %12 = vector.load %arg8[%c0_21, %c2, %c0_22] : memref<8x18x256xbf16, #tpu.memory_space<vmem>>, vector<8x16x256xbf16>
    %13 = tpu.concatenate %10, %11, %12 in 2 : vector<8x16x256xbf16>, vector<8x16x256xbf16>, vector<8x16x256xbf16> -> vector<8x16x768xbf16>
    %14 = vector.shape_cast %13 : vector<8x16x768xbf16> to vector<128x768xbf16>
    %c0_23 = arith.constant 0 : index
    %c0_24 = arith.constant 0 : index
    %15 = vector.load %arg4[%c0_23, %c0_24] : memref<768x512xbf16, #tpu.memory_space<vmem>>, vector<768x512xbf16>
    %cst_25 = arith.constant dense<0.000000e+00> : vector<128x512xf32>
    %16 = tpu.matmul %14, %15, %cst_25 {dimension_numbers = #tpu.dot_dimension_numbers<[1], [0], [0], [1], [0, 0, 1, 1], [], []>} : vector<128x768xbf16>, vector<768x512xbf16>, vector<128x512xf32> -> vector<128x512xf32>
    %c0_26 = arith.constant 0 : index
    %c0_27 = arith.constant 0 : index
    %17 = vector.load %arg5[%c0_26, %c0_27] : memref<1x512xf32, #tpu.memory_space<vmem>>, vector<1x512xf32>
    %18 = vector.broadcast %17 : vector<1x512xf32> to vector<128x512xf32>
    %19 = arith.addf %16, %18 : vector<128x512xf32>
    %20 = vector.extract_strided_slice %19 {offsets = [0, 0], sizes = [128, 128], strides = [1, 1]} : vector<128x512xf32> to vector<128x128xf32>
    %21 = arith.negf %20 : vector<128x128xf32>
    %22 = math.exp %21 : vector<128x128xf32>
    %cst_28 = arith.constant 1.000000e+00 : f32
    %23 = vector.broadcast %cst_28 : f32 to vector<128x128xf32>
    %24 = arith.addf %23, %22 : vector<128x128xf32>
    %25 = arith.divf %23, %24 : vector<128x128xf32>
    %26 = vector.extract_strided_slice %19 {offsets = [0, 128], sizes = [128, 128], strides = [1, 1]} : vector<128x512xf32> to vector<128x128xf32>
    %27 = arith.negf %26 : vector<128x128xf32>
    %28 = math.exp %27 : vector<128x128xf32>
    %cst_29 = arith.constant 1.000000e+00 : f32
    %29 = vector.broadcast %cst_29 : f32 to vector<128x128xf32>
    %30 = arith.addf %29, %28 : vector<128x128xf32>
    %31 = arith.divf %29, %30 : vector<128x128xf32>
    %32 = vector.extract_strided_slice %19 {offsets = [0, 256], sizes = [128, 128], strides = [1, 1]} : vector<128x512xf32> to vector<128x128xf32>
    %33 = math.tanh %32 : vector<128x128xf32>
    %34 = vector.extract_strided_slice %19 {offsets = [0, 384], sizes = [128, 128], strides = [1, 1]} : vector<128x512xf32> to vector<128x128xf32>
    %35 = arith.negf %34 : vector<128x128xf32>
    %36 = math.exp %35 : vector<128x128xf32>
    %cst_30 = arith.constant 1.000000e+00 : f32
    %37 = vector.broadcast %cst_30 : f32 to vector<128x128xf32>
    %38 = arith.addf %37, %36 : vector<128x128xf32>
    %39 = arith.divf %37, %38 : vector<128x128xf32>
    %c0_31 = arith.constant 0 : index
    %c0_32 = arith.constant 0 : index
    %c0_33 = arith.constant 0 : index
    %40 = vector.load %arg3[%c0_31, %c0_32, %c0_33] : memref<8x16x128xf32, #tpu.memory_space<vmem>>, vector<8x16x128xf32>
    %41 = vector.shape_cast %40 : vector<8x16x128xf32> to vector<128x128xf32>
    %42 = arith.mulf %31, %41 : vector<128x128xf32>
    %43 = arith.mulf %25, %33 : vector<128x128xf32>
    %44 = arith.addf %42, %43 : vector<128x128xf32>
    %45 = math.tanh %44 : vector<128x128xf32>
    %46 = arith.mulf %39, %45 : vector<128x128xf32>
    %47 = vector.shape_cast %44 : vector<128x128xf32> to vector<8x16x128xf32>
    %c0_34 = arith.constant 0 : index
    %c0_35 = arith.constant 0 : index
    %c0_36 = arith.constant 0 : index
    %48 = vector.load %arg7[%c0_34, %c0_35, %c0_36] : memref<8x16x128xf32, #tpu.memory_space<vmem>>, vector<8x16x128xf32>
    tpu.vector_store %arg7[%c0_34, %c0_35, %c0_36], %47 {strides = array<i32>} : memref<8x16x128xf32, #tpu.memory_space<vmem>>, vector<8x16x128xf32>,
    %49 = vector.shape_cast %46 : vector<128x128xf32> to vector<8x16x128xf32>
    %c0_37 = arith.constant 0 : index
    %c0_38 = arith.constant 0 : index
    %c0_39 = arith.constant 0 : index
    %50 = vector.load %arg6[%c0_37, %c0_38, %c0_39] : memref<8x16x128xf32, #tpu.memory_space<vmem>>, vector<8x16x128xf32>
    tpu.vector_store %arg6[%c0_37, %c0_38, %c0_39], %49 {strides = array<i32>} : memref<8x16x128xf32, #tpu.memory_space<vmem>>, vector<8x16x128xf32>,
    return
  }
  func.func @transform_0(%arg0: i32) -> (i32, i32, i32) {
    %c0_i32 = arith.constant 0 : i32
    %c0_i32_0 = arith.constant 0 : i32
    %c0_i32_1 = arith.constant 0 : i32
    return %arg0, %c0_i32, %c0_i32_0 : i32, i32, i32
  }
  func.func @transform_1(%arg0: i32) -> (i32, i32, i32) {
    %c0_i32 = arith.constant 0 : i32
    %c0_i32_0 = arith.constant 0 : i32
    %c0_i32_1 = arith.constant 0 : i32
    return %arg0, %c0_i32, %c0_i32_0 : i32, i32, i32
  }
  func.func @transform_2(%arg0: i32) -> (i32, i32, i32) {
    %c0_i32 = arith.constant 0 : i32
    %c0_i32_0 = arith.constant 0 : i32
    %c0_i32_1 = arith.constant 0 : i32
    return %arg0, %c0_i32, %c0_i32_0 : i32, i32, i32
  }
  func.func @transform_3(%arg0: i32) -> (i32, i32) {
    %c0_i32 = arith.constant 0 : i32
    %c0_i32_0 = arith.constant 0 : i32
    %c0_i32_1 = arith.constant 0 : i32
    return %c0_i32, %c0_i32_0 : i32, i32
  }
  func.func @transform_4(%arg0: i32) -> (i32, i32) {
    %c0_i32 = arith.constant 0 : i32
    %c0_i32_0 = arith.constant 0 : i32
    %c0_i32_1 = arith.constant 0 : i32
    return %c0_i32, %c0_i32_0 : i32, i32
  }
  func.func @transform_5(%arg0: i32) -> (i32, i32, i32) {
    %c0_i32 = arith.constant 0 : i32
    %c0_i32_0 = arith.constant 0 : i32
    %c0_i32_1 = arith.constant 0 : i32
    return %arg0, %c0_i32, %c0_i32_0 : i32, i32, i32
  }
  func.func @transform_6(%arg0: i32) -> (i32, i32, i32) {
    %c0_i32 = arith.constant 0 : i32
    %c0_i32_0 = arith.constant 0 : i32
    %c0_i32_1 = arith.constant 0 : i32
    return %arg0, %c0_i32, %c0_i32_0 : i32, i32, i32
  }
}

</mosaic_0001>

<bundles_post_ra>
// kernel: conv_lstm_cell_forward.1
= control target key start
LH: loop header
LB: loop body
LE: loop exit
PB: predicated region body
PF: predicated region fallthrough
CT: control target
= control target key end

     0   :  { %s5040_s21 = smov 0   ;;  %s6425_s0 = inlined_call_operand.vmem [shape: f32[16,16,128], index: 0, kind: input, shape index: {}]   ;;  %s6426_s1 = inlined_call_operand.vmem [shape: f32[16,16,128], index: 1, kind: input, shape index: {}, may-alias: {1,5}]   ;;  %s6427_s2 = inlined_call_operand.vmem [shape: f32[16,16,128], index: 2, kind: input, shape index: {}, may-alias: {2,6}]   ;;  %s6428_s3 = inlined_call_operand.vmem [shape: bf16[768,512], index: 3, kind: input, shape index: {}]   ;;  %s6429_s4 = inlined_call_operand.vmem [shape: f32[1,512], index: 4, kind: input, shape index: {}]   ;;  %s6430_s5 = inlined_call_operand.vmem [shape: f32[16,16,128], index: 5, kind: output, shape index: {0}, may-alias: {1,5}]   ;;  %s6431_s6 = inlined_call_operand.vmem [shape: f32[16,16,128], index: 6, kind: output, shape index: {1}, may-alias: {2,6}]  }
   0x1 LB: > { %s3819_s22 = sadd.s32 4294967295, %s5003_s21   ;;  %p3823_p0 = scmp.ge.s32.totalorder %s5003_s21, 1  ;;  %s5003_s21 = sphi %s5040_s21, %s17_s21  }
   0x2   : > { %p241_p1 = scmp.lt.s32.totalorder %s5003_s21, 3 }
   0x4   : > { %p242_p2 = pnand %p3823_p0, %p241_p1 }
   0x5   : > { %v4398_v0 = vld [vmem:[%s6428_s3 + $0x4] ss:$16 sps:$4 sm:$0xff] (!%p242_p2)   ;;  %v4400_v1 = vld [vmem:[%s6428_s3 + $0xc] ss:$16 sps:$4 sm:$0xff] (!%p242_p2)   ;;  %v4402_v2 = vld [vmem:[%s6428_s3] ss:$16 sps:$4 sm:$0xff] (!%p242_p2)  }
   0x6   : > { %245 = sbr.rel (%p242_p2) target bundleno = 580 (0x244), region = 40  ;;  %2591 = vmatprep.subr.bf16.mxu0 (!%p242_p2), %v4398_v0  ;;  %v4403_v3 = vld [vmem:[%s6428_s3 + $0x8] ss:$16 sps:$4 sm:$0xff] (!%p242_p2)   ;;  %2930 = vmatprep.subr.bf16.mxu1 (!%p242_p2), %v4400_v1  ;;  %v4404_v4 = vld [vmem:[%s6428_s3 + $0x24] ss:$16 sps:$4 sm:$0xff] (!%p242_p2)   ;;  %s3824_s15 = sshll.u32 (!%p242_p2), %s3819_s22, 3 }
   0x7   : > { %2592 = vmatpush1.bf16.msra.mxu0 (!%p242_p2), %v4402_v2  ;;  %2931 = vmatpush1.bf16.msra.mxu1 (!%p242_p2), %v4403_v3  ;;  %v4406_v5 = vld [vmem:[%s6428_s3 + $0x2c] ss:$16 sps:$4 sm:$0xff] (!%p242_p2)   ;;  %v4408_v6 = vld [vmem:[%s6428_s3 + $0x20] ss:$16 sps:$4 sm:$0xff] (!%p242_p2)   ;;  %v4409_v7 = vld [vmem:[%s6428_s3 + $0x28] ss:$16 sps:$4 sm:$0xff] (!%p242_p2)  }
   0x8   : > { %2593 = vmatprep.subr.bf16.mxu0 (!%p242_p2), %v4404_v4  ;;  %2932 = vmatprep.subr.bf16.mxu1 (!%p242_p2), %v4406_v5  ;;  %v4410_v8 = vld [vmem:[%s6428_s3 + $0x44] ss:$16 sps:$4 sm:$0xff] (!%p242_p2)   ;;  %v4412_v9 = vld [vmem:[%s6428_s3 + $0x4c] ss:$16 sps:$4 sm:$0xff] (!%p242_p2)   ;;  %v4414_v10 = vld [vmem:[%s6428_s3 + $0x40] ss:$16 sps:$4 sm:$0xff] (!%p242_p2)  }
   0x9   : > { %v4415_v11 = vld [vmem:[%s6428_s3 + $0x48] ss:$16 sps:$4 sm:$0xff] (!%p242_p2)   ;;  %v4416_v12 = vld [vmem:[%s6428_s3 + $0x64] ss:$16 sps:$4 sm:$0xff] (!%p242_p2)   ;;  %v4418_v13 = vld [vmem:[%s6428_s3 + $0x6c] ss:$16 sps:$4 sm:$0xff] (!%p242_p2)  }
   0xa   : > { %v4420_v14 = vld [vmem:[%s6428_s3 + $0x60] ss:$16 sps:$4 sm:$0xff] (!%p242_p2)   ;;  %v4421_v15 = vld [vmem:[%s6428_s3 + $0x68] ss:$16 sps:$4 sm:$0xff] (!%p242_p2)   ;;  %v4422_v16 = vld [vmem:[%s6428_s3 + $0x84] ss:$16 sps:$4 sm:$0xff] (!%p242_p2)  }
   0xb   : > { %2594 = vmatpush1.bf16.msra.mxu0 (!%p242_p2), %v4408_v6  ;;  %2933 = vmatpush1.bf16.msra.mxu1 (!%p242_p2), %v4409_v7  ;;  %v4424_v17 = vld [vmem:[%s6428_s3 + $0x8c] ss:$16 sps:$4 sm:$0xff] (!%p242_p2)   ;;  %v4426_v18 = vld [vmem:[%s6428_s3 + $0x80] ss:$16 sps:$4 sm:$0xff] (!%p242_p2)   ;;  %v4427_v19 = vld [vmem:[%s6428_s3 + $0x88] ss:$16 sps:$4 sm:$0xff] (!%p242_p2)  }
   0xc   : > { %2595 = vmatprep.subr.bf16.mxu0 (!%p242_p2), %v4410_v8  ;;  %2934 = vmatprep.subr.bf16.mxu1 (!%p242_p2), %v4412_v9  ;;  %v4428_v20 = vld [vmem:[%s6428_s3 + $0xa4] ss:$16 sps:$4 sm:$0xff] (!%p242_p2)   ;;  %v4430_v21 = vld [vmem:[%s6428_s3 + $0xac] ss:$16 sps:$4 sm:$0xff] (!%p242_p2)   ;;  %v4432_v22 = vld [vmem:[%s6428_s3 + $0xa0] ss:$16 sps:$4 sm:$0xff] (!%p242_p2)  }
   0xd   : > { %v4433_v23 = vld [vmem:[%s6428_s3 + $0xa8] ss:$16 sps:$4 sm:$0xff]   ;;  %v4434_v24 = vld [vmem:[%s6428_s3 + $0xc4] ss:$16 sps:$4 sm:$0xff]   ;;  %v4436_v25 = vld [vmem:[%s6428_s3 + $0xcc] ss:$16 sps:$4 sm:$0xff]  }
   0xe   : > { %v4438_v26 = vld [vmem:[%s6428_s3 + $0xc0] ss:$16 sps:$4 sm:$0xff]   ;;  %v4439_v27 = vld [vmem:[%s6428_s3 + $0xc8] ss:$16 sps:$4 sm:$0xff]   ;;  %v4440_v28 = vld [vmem:[%s6428_s3 + $0xe4] ss:$16 sps:$4 sm:$0xff]  }
   0xf   : > { %2596 = vmatpush1.bf16.msra.mxu0 %v4414_v10  ;;  %2935 = vmatpush1.bf16.msra.mxu1 %v4415_v11  ;;  %v4442_v29 = vld [vmem:[%s6428_s3 + $0xec] ss:$16 sps:$4 sm:$0xff]   ;;  %v4444_v30 = vld [vmem:[%s6428_s3 + $0xe0] ss:$16 sps:$4 sm:$0xff]   ;;  %v4445_v31 = vld [vmem:[%s6428_s3 + $0xe8] ss:$16 sps:$4 sm:$0xff]  }
  0x10   : > { %2597 = vmatprep.subr.bf16.mxu0 %v4416_v12  ;;  %2936 = vmatprep.subr.bf16.mxu1 %v4418_v13  ;;  %v4446_v32 = vld [vmem:[%s6428_s3 + $0x104] ss:$16 sps:$4 sm:$0xff]   ;;  %v4448_v33 = vld [vmem:[%s6428_s3 + $0x10c] ss:$16 sps:$4 sm:$0xff]   ;;  %p292_p3 = scmp.lt.s32.totalorder %s3824_s15, 15  ;;  %vm327_vm0 = vcmask 1040384  }
  0x11   : > { %v4450_v34 = vld [vmem:[%s6428_s3 + $0x100] ss:$16 sps:$4 sm:$0xff]   ;;  %v4451_v35 = vld [vmem:[%s6428_s3 + $0x108] ss:$16 sps:$4 sm:$0xff]   ;;  %v4452_v36 = vld [vmem:[%s6428_s3 + $0x124] ss:$16 sps:$4 sm:$0xff]  }
  0x12   : > { %v4454_v37 = vld [vmem:[%s6428_s3 + $0x12c] ss:$16 sps:$4 sm:$0xff]   ;;  %s6447_s15 = smov (!%p292_p3, %s3824_s15), 15  ;;  %v4456_v38 = vld [vmem:[%s6428_s3 + $0x120] ss:$16 sps:$4 sm:$0xff]   ;;  %vm330_vm1 = vcmask 1044484  }
  0x13   : > { %2598 = vmatpush1.bf16.msra.mxu0 %v4420_v14  ;;  %2937 = vmatpush1.bf16.msra.mxu1 %v4421_v15  ;;  %v4457_v39 = vld [vmem:[%s6428_s3 + $0x128] ss:$16 sps:$4 sm:$0xff]   ;;  %v4458_v40 = vld [vmem:[%s6428_s3 + $0x144] ss:$16 sps:$4 sm:$0xff]   ;;  %v4460_v41 = vld [vmem:[%s6428_s3 + $0x14c] ss:$16 sps:$4 sm:$0xff]  }
  0x14   : > { %2599 = vmatprep.subr.bf16.mxu0 %v4422_v16  ;;  %2938 = vmatprep.subr.bf16.mxu1 %v4424_v17  ;;  %s5176_s18 = sshll.u32 %s6447_s15, 4  ;;  %v4462_v42 = vld [vmem:[%s6428_s3 + $0x140] ss:$16 sps:$4 sm:$0xff]   ;;  %v4463_v43 = vld [vmem:[%s6428_s3 + $0x148] ss:$16 sps:$4 sm:$0xff]   ;;  %vm613_vm10 = vcmask 1043456  }
  0x15   : > { %vm328_vm2 = vsmask.f32 256  ;;  %v4464_v44 = vld [vmem:[%s6428_s3 + $0x164] ss:$16 sps:$4 sm:$0xff]   ;;  %s5191_s27 = scalar_lea.vmem %s6426_s1, %s5176_s18  ;;  %vm331_vm3 = vsmask.f32 4352  ;;  %s5200_s8 = scalar_lea.vmem %s6425_s0, %s5176_s18 }
  0x16   : > { %v4466_v45 = vld [vmem:[%s6428_s3 + $0x16c] ss:$16 sps:$4 sm:$0xff]   ;;  %v4468_v46 = vld [vmem:[%s6428_s3 + $0x160] ss:$16 sps:$4 sm:$0xff]   ;;  %v4469_v47 = vld [vmem:[%s6428_s3 + $0x168] ss:$16 sps:$4 sm:$0xff]   ;;  %s6149_s9 = scalar_lea.vmem %s6427_s2, %s5176_s18  ;;  %s6206_s12 = scalar_lea.vmem %s6431_s6, %s5176_s18 }
  0x17   : > { %2600 = vmatpush1.bf16.msra.mxu0 %v4426_v18  ;;  %2939 = vmatpush1.bf16.msra.mxu1 %v4427_v19  ;;  %vm5210_vm4 = vmand %vm327_vm0, %vm328_vm2  ;;  %v4470_v49 = vld [vmem:[%s6428_s3 + $0x184] ss:$16 sps:$4 sm:$0xff]   ;;  %vm358_vm6 = vsmask.f32 7938  ;;  %v388_v53 = vld [vmem:[%s5191_s27 + $0x8] sm:$0xff]  ;;  %s6273_s16 = scalar_lea.vmem %s6430_s5, %s5176_s18 }
  0x18   : > { %2601 = vmatprep.subr.bf16.mxu0 %v4428_v20  ;;  %2940 = vmatprep.subr.bf16.mxu1 %v4430_v21  ;;  %vm332_vm5 = vmand %vm330_vm1, %vm331_vm3  ;;  %v334_v50 = vld [vmem:[#allocation2] sm:$0x11]  ;;  %vm451_vm8 = vsmask.f32 4368  ;;  %vm360_vm9 = vsmask.f32 7954  ;;  %v4167_v58 = vpack.c.bf16 %v388_v53, %v388_v53 }
  0x19   : > { %v387_v51 = vld [vmem:[%s5191_s27] sm:$0xff]  ;;  %vm5221_vm7 = vmor %vm332_vm5, %vm5210_vm4  ;;  %v4472_v56 = vld [vmem:[%s6428_s3 + $0x18c] ss:$16 sps:$4 sm:$0xff]  }
  0x1a   : > { %v4166_v54 = vpack.c.bf16 %v387_v51, %v387_v51  ;;  %v671_v55 = vld [vmem:[%s5200_s8] sm:$0xff]  ;;  %v335_v57 = vsel %vm5221_vm7, 0, %v334_v50  ;;  %v672_v59 = vld [vmem:[%s5200_s8 + $0x8] sm:$0xff]  ;;  %v462_v2 = vshrl.u32 %v4167_v58, 16  ;;  %v465_v3 = vshll.u32 %v4167_v58, 16  ;;  %vm5241_vm11 = vmand %vm327_vm0, %vm358_vm6 }
  0x1b   : > { %2602 = vmatpush1.bf16.msra.mxu0 %v4432_v22  ;;  %2941 = vmatpush1.bf16.msra.mxu1 %v4433_v23  ;;  %v4182_v60 = vpack.c.bf16 %v671_v55, %v671_v55  ;;  %v4474_v61 = vld [vmem:[%s6428_s3 + $0x180] ss:$16 sps:$4 sm:$0xff]   ;;  %336 = vst [vmem:[#allocation2] sm:$0x11] %v335_v57  ;;  %v4183_v0 = vpack.c.bf16 %v672_v59, %v672_v59  ;;  %v4475_v1 = vld [vmem:[%s6428_s3 + $0x188] ss:$16 sps:$4 sm:$0xff]   ;;  %vm5261_vm12 = vmor %vm328_vm2, %vm451_vm8 }
  0x1c   : > { %2603 = vmatprep.subr.bf16.mxu0 %v4434_v24  ;;  %2942 = vmatprep.subr.bf16.mxu1 %v4436_v25  ;;  %v454_v62 = vshrl.u32 %v4166_v54, 16  ;;  %v457_v63 = vshll.u32 %v4166_v54, 16  ;;  %v4476_v10 = vld [vmem:[%s6428_s3 + $0x1a4] ss:$16 sps:$4 sm:$0xff]   ;;  %v4478_v11 = vld [vmem:[%s6428_s3 + $0x1ac] ss:$16 sps:$4 sm:$0xff]   ;;  %vm5276_vm13 = vmand %vm613_vm10, %vm358_vm6 }
  0x1d   : > { %v736_v4 = vshrl.u32 %v4182_v60, 16  ;;  %v739_v5 = vshll.u32 %v4182_v60, 16  ;;  %v744_v8 = vshrl.u32 %v4183_v0, 16  ;;  %v747_v9 = vshll.u32 %v4183_v0, 16  ;;  %v4480_v14 = vld [vmem:[%s6428_s3 + $0x1a0] ss:$16 sps:$4 sm:$0xff]   ;;  %vm5284_vm14 = vmand %vm330_vm1, %vm360_vm9 }
  0x1e   : > { %v456_v7 = vrot.slane %v454_v62, 7  ;;  %v5251_v12 = vrot.slane %v462_v2, 7  ;;  %v4481_v15 = vld [vmem:[%s6428_s3 + $0x1a8] ss:$16 sps:$4 sm:$0xff]   ;;  %v4482_v20 = vld [vmem:[%s6428_s3 + $0x1c4] ss:$16 sps:$4 sm:$0xff]   ;;  %vm5317_vm15 = vmor %vm5284_vm14, %vm5241_vm11 }
  0x1f   : > { %2604 = vmatpush1.bf16.msra.mxu0 %v4438_v26  ;;  %2943 = vmatpush1.bf16.msra.mxu1 %v4439_v27  ;;  %v738_v13 = vrot.slane %v736_v4, 7  ;;  %v5265_v19 = vrot.slane %v744_v8, 7  ;;  %v4484_v21 = vld [vmem:[%s6428_s3 + $0x1cc] ss:$16 sps:$4 sm:$0xff]   ;;  %v4493_v2 = vld [vmem:[%s6428_s3 + $0x1e8] ss:$16 sps:$4 sm:$0xff]  }
  0x20   : > { %2605 = vmatprep.subr.bf16.mxu0 %v4440_v28  ;;  %2944 = vmatprep.subr.bf16.mxu1 %v4442_v29  ;;  %v459_v17 = vor.u32 %v457_v63, %v456_v7  ;;  %v460_v18 = vrot.slane %v456_v7, 4  ;;  %v467_v22 = vor.u32 %v465_v3, %v5251_v12  ;;  %v337_v27 = vld [vmem:[#allocation2 + $0x18] sm:$0x11]  ;;  %v389_v28 = vld [vmem:[%s5191_s27 + $0x10] sm:$0xff]  ;;  %v675_v29 = vld [vmem:[%s5200_s8 + $0x20] sm:$0xff]  ;;  %vm1352_vm1 = vcmask 1046528  }
  0x21   : > { %v741_v24 = vor.u32 %v739_v5, %v738_v13  ;;  %v742_v25 = vrot.slane %v738_v13, 4  ;;  %v749_v26 = vor.u32 %v747_v9, %v5265_v19  ;;  %v4490_v53 = vld [vmem:[%s6428_s3 + $0x1ec] ss:$16 sps:$4 sm:$0xff]   ;;  %v4498_v3 = vld [vmem:[%s6428_s3 + $0x204] ss:$16 sps:$4 sm:$0xff]  }
  0x22   : > { %v4501_v4 = vld [vmem:[%s6428_s3 + $0x20c] ss:$16 sps:$4 sm:$0xff]   ;;  %v4588_v23 = vld [vmem:[%s6428_s3 + $0x3a4] ss:$16 sps:$4 sm:$0xff]   ;;  %v4589_v16 = vld [vmem:[%s6428_s3 + $0x3a8] ss:$16 sps:$4 sm:$0xff]  }
  0x23   : > { %2606 = vmatpush1.bf16.msra.mxu0 %v4444_v30  ;;  %2945 = vmatpush1.bf16.msra.mxu1 %v4445_v31  ;;  %v468_v30 = vsel %vm5261_vm12, %v460_v18, %v467_v22  ;;  %v615_v31 = vld [vmem:[#allocation2] sm:$0xf]  ;;  %vm1103_vm0 = vsmask.f32 7424 }
  0x24   : > { %2607 = vmatprep.subr.bf16.mxu0 %v4446_v32  ;;  %2946 = vmatprep.subr.bf16.mxu1 %v4448_v33  ;;  %v895_v32 = vld [vmem:[#allocation2 + $0x4] sm:$0xf]  ;;  %v338_v33 = vsel %vm5221_vm7, 0, %v337_v27  ;;  %618 = vst [vmem:[#allocation2 + $0x8] sm:$0xf] %v468_v30  ;;  %v676_v30 = vld [vmem:[%s5200_s8 + $0x28] sm:$0xff] }
  0x25   : > { %339 = vst [vmem:[#allocation2 + $0x18] sm:$0x11] %v338_v33 }
  0x27   : > { %2608 = vmatpush1.bf16.msra.mxu0 %v4450_v34  ;;  %2947 = vmatpush1.bf16.msra.mxu1 %v4451_v35  ;;  %v390_v34 = vld [vmem:[%s5191_s27 + $0x18] sm:$0xff]  ;;  %v4168_v35 = vpack.c.bf16 %v389_v28, %v389_v28  ;;  %v392_v28 = vld [vmem:[%s5191_s27 + $0x28] sm:$0xff] }
  0x28   : > { %2609 = vmatprep.subr.bf16.mxu0 %v4452_v36  ;;  %2948 = vmatprep.subr.bf16.mxu1 %v4454_v37  ;;  %v4486_v36 = vld [vmem:[%s6428_s3 + $0x1c0] ss:$16 sps:$4 sm:$0xff]   ;;  %v616_v37 = vsel %vm5276_vm13, %v459_v17, %v615_v31  ;;  %v4499_v17 = vld [vmem:[%s6428_s3 + $0x208] ss:$16 sps:$4 sm:$0xff]  }
  0x29   : > { %617 = vst [vmem:[#allocation2] sm:$0xf] %v616_v37  ;;  %v4186_v37 = vpack.c.bf16 %v675_v29, %v675_v29  ;;  %v4516_v29 = vld [vmem:[%s6428_s3 + $0x260] ss:$16 sps:$4 sm:$0xff]  }
  0x2b   : > { %2610 = vmatpush1.bf16.msra.mxu0 %v4456_v38  ;;  %2949 = vmatpush1.bf16.msra.mxu1 %v4457_v39  ;;  %v750_v38 = vsel %vm5261_vm12, %v742_v25, %v749_v26  ;;  %v896_v39 = vsel %vm5276_vm13, %v741_v24, %v895_v32  ;;  %v4171_v32 = vpack.c.bf16 %v392_v28, %v392_v28  ;;  %v678_v28 = vld [vmem:[%s5200_s8 + $0x38] sm:$0xff] }
  0x2c   : > { %2611 = vmatprep.subr.bf16.mxu0 %v4458_v40  ;;  %2950 = vmatprep.subr.bf16.mxu1 %v4460_v41  ;;  %v4169_v40 = vpack.c.bf16 %v390_v34, %v390_v34  ;;  %v673_v41 = vld [vmem:[%s5200_s8 + $0x10] sm:$0xff]  ;;  %897 = vst [vmem:[#allocation2 + $0x4] sm:$0xf] %v896_v39  ;;  %898 = vst [vmem:[#allocation2 + $0xc] sm:$0xf] %v750_v38  ;;  %v4187_v38 = vpack.c.bf16 %v676_v30, %v676_v30 }
  0x2d   : > { %v622_v6 = vld [vmem:[#allocation2 + $0x18] sm:$0xf]  ;;  %v4504_v34 = vld [vmem:[%s6428_s3 + $0x224] ss:$16 sps:$4 sm:$0xff]   ;;  %v4502_v39 = vld [vmem:[%s6428_s3 + $0x220] ss:$16 sps:$4 sm:$0xff]  }
  0x2e   : > { %v479_v50 = vshrl.u32 %v4169_v40, 16  ;;  %v482_v51 = vshll.u32 %v4169_v40, 16 }
  0x2f   : > { %2612 = vmatpush1.bf16.msra.mxu0 %v4462_v42  ;;  %2951 = vmatpush1.bf16.msra.mxu1 %v4463_v43  ;;  %v674_v42 = vld [vmem:[%s5200_s8 + $0x18] sm:$0xff] }
  0x30   : > { %2613 = vmatprep.subr.bf16.mxu0 %v4464_v44  ;;  %2952 = vmatprep.subr.bf16.mxu1 %v4466_v45  ;;  %v4487_v43 = vld [vmem:[%s6428_s3 + $0x1c8] ss:$16 sps:$4 sm:$0xff]   ;;  %v471_v44 = vshrl.u32 %v4168_v35, 16  ;;  %v474_v45 = vshll.u32 %v4168_v35, 16  ;;  %v5321_v59 = vrot.slane %v479_v50, 7 }
  0x31   : > { %v4507_v35 = vld [vmem:[%s6428_s3 + $0x22c] ss:$16 sps:$4 sm:$0xff]  }
  0x32   : > { %v473_v54 = vrot.slane %v471_v44, 7  ;;  %v484_v5 = vor.u32 %v482_v51, %v5321_v59  ;;  %v770_v44 = vshrl.u32 %v4186_v37, 16 }
  0x33   : > { %2614 = vmatpush1.bf16.msra.mxu0 %v4468_v46  ;;  %2953 = vmatpush1.bf16.msra.mxu1 %v4469_v47  ;;  %v4184_v46 = vpack.c.bf16 %v673_v41, %v673_v41  ;;  %v4185_v47 = vpack.c.bf16 %v674_v42, %v674_v42  ;;  %v951_v13 = vld [vmem:[#allocation2] sm:$0xff]  ;;  %v496_v41 = vshrl.u32 %v4171_v32, 16  ;;  %v499_v42 = vshll.u32 %v4171_v32, 16 }
  0x34   : > { %2615 = vmatprep.subr.bf16.mxu0 %v4470_v49  ;;  %2954 = vmatprep.subr.bf16.mxu1 %v4472_v56  ;;  %v4488_v49 = vld [vmem:[%s6428_s3 + $0x1e4] ss:$16 sps:$4 sm:$0xff]   ;;  %v476_v62 = vor.u32 %v474_v45, %v473_v54  ;;  %v477_v63 = vrot.slane %v473_v54, 4  ;;  %v773_v45 = vshll.u32 %v4186_v37, 16 }
  0x35   : > { %v753_v55 = vshrl.u32 %v4184_v46, 16  ;;  %v756_v56 = vshll.u32 %v4184_v46, 16  ;;  %v761_v57 = vshrl.u32 %v4185_v47, 16  ;;  %v764_v60 = vshll.u32 %v4185_v47, 16 }
  0x36   : > { %v485_v18 = vsel %vm5261_vm12, %v477_v63, %v484_v5  ;;  %v778_v46 = vshrl.u32 %v4187_v38, 16  ;;  %v781_v47 = vshll.u32 %v4187_v38, 16  ;;  %v5382_v51 = vrot.slane %v496_v41, 7  ;;  %v343_v63 = vld [vmem:[#allocation2 + $0x48] sm:$0x11] }
  0x37   : > { %2616 = vmatpush1.bf16.msra.mxu0 %v4474_v61  ;;  %2955 = vmatpush1.bf16.msra.mxu1 %v4475_v1  ;;  %v4492_v61 = vld [vmem:[%s6428_s3 + $0x1e0] ss:$16 sps:$4 sm:$0xff]   ;;  %v755_v0 = vrot.slane %v753_v55, 7  ;;  %v5326_v1 = vrot.slane %v761_v57, 7  ;;  %625 = vst [vmem:[#allocation2 + $0x20] sm:$0xf] %v485_v18 }
  0x38   : > { %2617 = vmatprep.subr.bf16.mxu0 %v4476_v10  ;;  %2956 = vmatprep.subr.bf16.mxu1 %v4478_v11  ;;  %v902_v10 = vld [vmem:[#allocation2 + $0x1c] sm:$0xf]  ;;  %v391_v11 = vld [vmem:[%s5191_s27 + $0x20] sm:$0xff]  ;;  %v772_v55 = vrot.slane %v770_v44, 7  ;;  %v393_v57 = vld [vmem:[%s5191_s27 + $0x30] sm:$0xff] }
  0x39   : > { %v758_v7 = vor.u32 %v756_v56, %v755_v0  ;;  %v759_v8 = vrot.slane %v755_v0, 4  ;;  %v766_v9 = vor.u32 %v764_v60, %v5326_v1  ;;  %v4170_v22 = vpack.c.bf16 %v391_v11, %v391_v11  ;;  %v4510_v60 = vld [vmem:[%s6428_s3 + $0x240] ss:$16 sps:$4 sm:$0xff]   ;;  %v4521_v5 = vld [vmem:[%s6428_s3 + $0x26c] ss:$16 sps:$4 sm:$0xff]  }
  0x3a   : > { %v5387_v56 = vrot.slane %v778_v46, 7  ;;  %v4172_v0 = vpack.c.bf16 %v393_v57, %v393_v57 }
  0x3b   : > { %2618 = vmatpush1.bf16.msra.mxu0 %v4480_v14  ;;  %2957 = vmatpush1.bf16.msra.mxu1 %v4481_v15  ;;  %v952_v14 = vld [vmem:[#allocation2 + $0x8] sm:$0xff]  ;;  %v4496_v15 = vld [vmem:[%s6428_s3 + $0x200] ss:$16 sps:$4 sm:$0xff]   ;;  %v767_v26 = vsel %vm5261_vm12, %v759_v8, %v766_v9  ;;  %v903_v27 = vsel %vm5276_vm13, %v758_v7, %v902_v10  ;;  %v488_v33 = vshrl.u32 %v4170_v22, 16  ;;  %v776_v7 = vrot.slane %v772_v55, 4  ;;  %v394_v10 = vld [vmem:[%s5191_s27 + $0x38] sm:$0xff] }
  0x3c   : > { %2619 = vmatprep.subr.bf16.mxu0 %v4482_v20  ;;  %2958 = vmatprep.subr.bf16.mxu1 %v4484_v21  ;;  %v623_v20 = vsel %vm5276_vm13, %v476_v62, %v622_v6  ;;  %v340_v21 = vld [vmem:[#allocation2 + $0x30] sm:$0x11]  ;;  %v5350_v24 = vcombine.high %v951_v13, %v952_v14  ;;  %v5352_v25 = vcombine.low %v951_v13, %v952_v14  ;;  %v344_v9 = vsel %vm5221_vm7, 0, %v343_v63 }
  0x3d   : > { %624 = vst [vmem:[#allocation2 + $0x18] sm:$0xf] %v623_v20  ;;  %904 = vst [vmem:[#allocation2 + $0x1c] sm:$0xf] %v903_v27  ;;  %v341_v31 = vsel %vm5221_vm7, 0, %v340_v21  ;;  %v490_v40 = vrot.slane %v488_v33, 7  ;;  %v501_v62 = vor.u32 %v499_v42, %v5382_v51  ;;  %v775_v6 = vor.u32 %v773_v45, %v772_v55 }
  0x3e   : > { %905 = vst [vmem:[#allocation2 + $0x24] sm:$0xf] %v767_v26  ;;  %2623 = vmatprep.mubr.bf16.mxu0 %v5350_v24  ;;  %2962 = vmatprep.mubr.bf16.mxu1 %v5350_v24  ;;  %342 = vst [vmem:[#allocation2 + $0x30] sm:$0x11] %v341_v31  ;;  %v783_v8 = vor.u32 %v781_v47, %v5387_v56  ;;  %v505_v18 = vshrl.u32 %v4172_v0, 16  ;;  %v677_v20 = vld [vmem:[%s5200_s8 + $0x30] sm:$0xff]  ;;  %v4173_v30 = vpack.c.bf16 %v394_v10, %v394_v10 }
  0x3f   : > { %2620 = vmatpush1.bf16.msra.mxu0 %v4486_v36  ;;  %2959 = vmatpush1.bf16.msra.mxu1 %v4487_v43  ;;  %v491_v36 = vshll.u32 %v4170_v22, 16  ;;  %v4505_v43 = vld [vmem:[%s6428_s3 + $0x228] ss:$16 sps:$4 sm:$0xff]   ;;  %v494_v50 = vrot.slane %v490_v40, 4  ;;  %345 = vst [vmem:[#allocation2 + $0x48] sm:$0x11] %v344_v9  ;;  %v4188_v32 = vpack.c.bf16 %v677_v20, %v677_v20  ;;  %v4189_v33 = vpack.c.bf16 %v678_v28, %v678_v28 }
  0x40   : > { %2621 = vmatprep.subr.bf16.mxu0 %v4488_v49  ;;  %2960 = vmatprep.subr.bf16.mxu1 %v4490_v53  ;;  %v4512_v49 = vld [vmem:[%s6428_s3 + $0x244] ss:$16 sps:$4 sm:$0xff]   ;;  %v4515_v53 = vld [vmem:[%s6428_s3 + $0x24c] ss:$16 sps:$4 sm:$0xff]   ;;  %v784_v22 = vsel %vm5261_vm12, %v776_v7, %v783_v8  ;;  %v508_v27 = vshll.u32 %v4172_v0, 16  ;;  %v507_v31 = vrot.slane %v505_v18, 7 }
  0x41   : > { %v493_v54 = vor.u32 %v491_v36, %v490_v40  ;;  %v502_v14 = vsel %vm5261_vm12, %v494_v50, %v501_v62  ;;  %912 = vst [vmem:[#allocation2 + $0x3c] sm:$0xf] %v784_v22  ;;  %v513_v37 = vshrl.u32 %v4173_v30, 16  ;;  %v516_v38 = vshll.u32 %v4173_v30, 16  ;;  %v4524_v50 = vld [vmem:[%s6428_s3 + $0x280] ss:$16 sps:$4 sm:$0xff]  }
  0x42   : > { %632 = vst [vmem:[#allocation2 + $0x38] sm:$0xf] %v502_v14  ;;  %v510_v36 = vor.u32 %v508_v27, %v507_v31  ;;  %v787_v40 = vshrl.u32 %v4188_v32, 16  ;;  %v790_v41 = vshll.u32 %v4188_v32, 16  ;;  %v795_v42 = vshrl.u32 %v4189_v33, 16  ;;  %v679_v10 = vld [vmem:[%s5200_s8 + $0x40] sm:$0xff] }
  0x43   : > { %2622 = vmatpush1.bf16.msra.mxu0 %v4492_v61  ;;  %2961 = vmatpush1.bf16.msra.mxu1 %v4493_v2  ;;  %v4513_v61 = vld [vmem:[%s6428_s3 + $0x248] ss:$16 sps:$4 sm:$0xff]   ;;  %v511_v44 = vrot.slane %v507_v31, 4  ;;  %v5437_v45 = vrot.slane %v513_v37, 7  ;;  %v4190_v22 = vpack.c.bf16 %v679_v10, %v679_v10 }
  0x44   : > { %2704 = vmatprep.subr.bf16.mxu0 %v4498_v3  ;;  %3043 = vmatprep.subr.bf16.mxu1 %v4501_v4  ;;  %v953_v2 = vld [vmem:[#allocation2 + $0x18] sm:$0xff]  ;;  %v4518_v4 = vld [vmem:[%s6428_s3 + $0x264] ss:$16 sps:$4 sm:$0xff]   ;;  %v789_v47 = vrot.slane %v787_v40, 7  ;;  %v680_v14 = vld [vmem:[%s5200_s8 + $0x48] sm:$0xff] }
  0x45   : > { %v954_v3 = vld [vmem:[#allocation2 + $0x20] sm:$0xff]  ;;  %v4533_v30 = vld [vmem:[%s6428_s3 + $0x2a8] ss:$16 sps:$4 sm:$0xff]  }
  0x46   : > { %2624 = vmatmul.mubr.bf16.vlgmr.msra.gmra.mrb[0].mxu0 %v5352_v25  ;;  %2963 = vmatmul.mubr.bf16.vlgmr.msra.gmra.mrb[0].mxu1 %v5352_v25  ;;  %v5407_v11 = vcombine.high %v953_v2, %v954_v3  ;;  %v5409_v13 = vcombine.low %v953_v2, %v954_v3  ;;  %v636_v46 = vld [vmem:[#allocation2 + $0x48] sm:$0xf]  ;;  %v916_v57 = vld [vmem:[#allocation2 + $0x4c] sm:$0xf]  ;;  %v792_v0 = vor.u32 %v790_v41, %v789_v47  ;;  %v793_v2 = vrot.slane %v789_v47, 4 }
  0x47   : > { %2705 = vmatpush1.bf16.msra.mxu0 %v4496_v15  ;;  %3044 = vmatpush1.bf16.msra.mxu1 %v4499_v17  ;;  %v629_v15 = vld [vmem:[#allocation2 + $0x30] sm:$0xf]  ;;  %v909_v17 = vld [vmem:[#allocation2 + $0x34] sm:$0xf]  ;;  %v637_v55 = vsel %vm5276_vm13, %v510_v36, %v636_v46 }
  0x48   : > { %2706 = vmatprep.subr.bf16.mxu0 %v4504_v34  ;;  %3045 = vmatprep.subr.bf16.mxu1 %v4507_v35  ;;  %v630_v21 = vsel %vm5276_vm13, %v493_v54, %v629_v15  ;;  %v910_v26 = vsel %vm5276_vm13, %v775_v6, %v909_v17  ;;  %v4519_v34 = vld [vmem:[%s6428_s3 + $0x268] ss:$16 sps:$4 sm:$0xff]   ;;  %v4526_v35 = vld [vmem:[%s6428_s3 + $0x284] ss:$16 sps:$4 sm:$0xff]   ;;  %v518_v54 = vor.u32 %v516_v38, %v5437_v45  ;;  %v4535_v17 = vld [vmem:[%s6428_s3 + $0x2ac] ss:$16 sps:$4 sm:$0xff]  }
  0x49   : > { %2633 = vmatprep.mubr.bf16.mxu0 %v5407_v11  ;;  %2972 = vmatprep.mubr.bf16.mxu1 %v5407_v11  ;;  %631 = vst [vmem:[#allocation2 + $0x30] sm:$0xf] %v630_v21  ;;  %911 = vst [vmem:[#allocation2 + $0x34] sm:$0xf] %v910_v26  ;;  %v956_v63 = vld [vmem:[#allocation2 + $0x38] sm:$0xff]  ;;  %v917_v20 = vsel %vm5276_vm13, %v792_v0, %v916_v57  ;;  %v397_v46 = vld [vmem:[%s5191_s27 + $0x50] sm:$0xff] }
  0x4a   : > { %638 = vst [vmem:[#allocation2 + $0x48] sm:$0xf] %v637_v55  ;;  %v519_v8 = vsel %vm5261_vm12, %v511_v44, %v518_v54  ;;  %v4532_v15 = vld [vmem:[%s6428_s3 + $0x2a4] ss:$16 sps:$4 sm:$0xff]   ;;  %v4530_v26 = vld [vmem:[%s6428_s3 + $0x2a0] ss:$16 sps:$4 sm:$0xff]  }
  0x4b   : > { %2707 = vmatpush1.bf16.msra.mxu0 %v4502_v39  ;;  %3046 = vmatpush1.bf16.msra.mxu1 %v4505_v43  ;;  %v4529_v39 = vld [vmem:[%s6428_s3 + $0x28c] ss:$16 sps:$4 sm:$0xff]   ;;  %v798_v43 = vshll.u32 %v4189_v33, 16  ;;  %639 = vst [vmem:[#allocation2 + $0x50] sm:$0xf] %v519_v8  ;;  %v804_v33 = vshrl.u32 %v4190_v22, 16 }
  0x4c   : > { %2708 = vmatprep.subr.bf16.mxu0 %v4512_v49  ;;  %3047 = vmatprep.subr.bf16.mxu1 %v4515_v53  ;;  %v5439_v49 = vrot.slane %v795_v42, 7  ;;  %v4527_v53 = vld [vmem:[%s6428_s3 + $0x288] ss:$16 sps:$4 sm:$0xff]   ;;  %918 = vst [vmem:[#allocation2 + $0x4c] sm:$0xf] %v917_v20 }
  0x4d   : > { %v4540_v38 = vld [vmem:[%s6428_s3 + $0x2c4] ss:$16 sps:$4 sm:$0xff]   ;;  %v806_v41 = vrot.slane %v804_v33, 7  ;;  %v398_v57 = vld [vmem:[%s5191_s27 + $0x58] sm:$0xff] }
  0x4e   : > { %2634 = vmatmul.mubr.bf16.gmra.mrb[4].mxu0 %v5409_v13  ;;  %2973 = vmatmul.mubr.bf16.gmra.mrb[4].mxu1 %v5409_v13  ;;  %v800_v3 = vor.u32 %v798_v43, %v5439_v49 }
  0x4f   : > { %2709 = vmatpush1.bf16.msra.mxu0 %v4510_v60  ;;  %3048 = vmatpush1.bf16.msra.mxu1 %v4513_v61  ;;  %v346_v60 = vld [vmem:[#allocation2 + $0x60] sm:$0x11]  ;;  %v810_v54 = vrot.slane %v806_v41, 4 }
  0x50   : > { %2710 = vmatprep.subr.bf16.mxu0 %v4518_v4  ;;  %3049 = vmatprep.subr.bf16.mxu1 %v4521_v5  ;;  %v395_v61 = vld [vmem:[%s5191_s27 + $0x40] sm:$0xff]  ;;  %v955_v62 = vld [vmem:[#allocation2 + $0x30] sm:$0xff]  ;;  %v347_v4 = vsel %vm5221_vm7, 0, %v346_v60  ;;  %v396_v5 = vld [vmem:[%s5191_s27 + $0x48] sm:$0xff]  ;;  %v801_v18 = vsel %vm5261_vm12, %v793_v2, %v800_v3  ;;  %v4176_v60 = vpack.c.bf16 %v397_v46, %v397_v46  ;;  %v4177_v3 = vpack.c.bf16 %v398_v57, %v398_v57 }
  0x51   : > { %v5455_v6 = vcombine.high %v955_v62, %v956_v63  ;;  %v5457_v7 = vcombine.low %v955_v62, %v956_v63  ;;  %348 = vst [vmem:[#allocation2 + $0x60] sm:$0x11] %v347_v4  ;;  %v4174_v9 = vpack.c.bf16 %v395_v61, %v395_v61  ;;  %v4175_v21 = vpack.c.bf16 %v396_v5, %v396_v5  ;;  %v4538_v61 = vld [vmem:[%s6428_s3 + $0x2c0] ss:$16 sps:$4 sm:$0xff]   ;;  %v4541_v62 = vld [vmem:[%s6428_s3 + $0x2c8] ss:$16 sps:$4 sm:$0xff]  }
  0x52   : > { %919 = vst [vmem:[#allocation2 + $0x54] sm:$0xf] %v801_v18  ;;  %v349_v2 = vld [vmem:[#allocation2 + $0x78] sm:$0x11]  ;;  %v681_v4 = vld [vmem:[%s5200_s8 + $0x50] sm:$0xff]  ;;  %v400_v57 = vld [vmem:[%s5191_s27 + $0x68] sm:$0xff] }
  0x53   : > { %2711 = vmatpush1.bf16.msra.mxu0 %v4516_v29  ;;  %3050 = vmatpush1.bf16.msra.mxu1 %v4519_v34  ;;  %v522_v27 = vshrl.u32 %v4174_v9, 16  ;;  %v525_v28 = vshll.u32 %v4174_v9, 16  ;;  %v4191_v29 = vpack.c.bf16 %v680_v14, %v680_v14  ;;  %v530_v31 = vshrl.u32 %v4175_v21, 16  ;;  %v957_v5 = vld [vmem:[#allocation2 + $0x48] sm:$0xff] }
  0x54   : > { %2712 = vmatprep.subr.bf16.mxu0 %v4526_v35  ;;  %3051 = vmatprep.subr.bf16.mxu1 %v4529_v39  ;;  %v533_v32 = vshll.u32 %v4175_v21, 16  ;;  %v807_v34 = vshll.u32 %v4190_v22, 16  ;;  %v4543_v39 = vld [vmem:[%s6428_s3 + $0x2cc] ss:$16 sps:$4 sm:$0xff]   ;;  %v350_v14 = vsel %vm5221_vm7, 0, %v349_v2 }
  0x55   : > { %2643 = vmatprep.mubr.bf16.mxu0 %v5455_v6  ;;  %2982 = vmatprep.mubr.bf16.mxu1 %v5455_v6  ;;  %v524_v35 = vrot.slane %v522_v27, 7  ;;  %v812_v36 = vshrl.u32 %v4191_v29, 16  ;;  %v815_v37 = vshll.u32 %v4191_v29, 16  ;;  %v5489_v40 = vrot.slane %v530_v31, 7  ;;  %v4546_v21 = vld [vmem:[%s6428_s3 + $0x2e4] ss:$16 sps:$4 sm:$0xff]  }
  0x56   : > { %2644 = vmatmul.mubr.bf16.gmra.mrb[8].mxu0 %v5457_v7  ;;  %2983 = vmatmul.mubr.bf16.gmra.mrb[8].mxu1 %v5457_v7  ;;  %351 = vst [vmem:[#allocation2 + $0x78] sm:$0x11] %v350_v14  ;;  %v4549_v27 = vld [vmem:[%s6428_s3 + $0x2ec] ss:$16 sps:$4 sm:$0xff]   ;;  %v547_v29 = vshrl.u32 %v4177_v3, 16  ;;  %v4192_v31 = vpack.c.bf16 %v681_v4, %v681_v4 }
  0x57   : > { %2713 = vmatpush1.bf16.msra.mxu0 %v4524_v50  ;;  %3052 = vmatpush1.bf16.msra.mxu1 %v4527_v53  ;;  %v527_v42 = vor.u32 %v525_v28, %v524_v35  ;;  %v528_v43 = vrot.slane %v524_v35, 4  ;;  %v5491_v44 = vrot.slane %v812_v36, 7  ;;  %v535_v47 = vor.u32 %v533_v32, %v5489_v40  ;;  %v4544_v32 = vld [vmem:[%s6428_s3 + $0x2e0] ss:$16 sps:$4 sm:$0xff]   ;;  %v4557_v46 = vld [vmem:[%s6428_s3 + $0x30c] ss:$16 sps:$4 sm:$0xff]  }
  0x58   : > { %2714 = vmatprep.subr.bf16.mxu0 %v4532_v15  ;;  %3053 = vmatprep.subr.bf16.mxu1 %v4535_v17  ;;  %v643_v50 = vld [vmem:[#allocation2 + $0x60] sm:$0xf]  ;;  %v809_v53 = vor.u32 %v807_v34, %v806_v41  ;;  %v923_v55 = vld [vmem:[#allocation2 + $0x64] sm:$0xf]  ;;  %v539_v15 = vshrl.u32 %v4176_v60, 16  ;;  %v682_v17 = vld [vmem:[%s5200_s8 + $0x58] sm:$0xff] }
  0x59   : > { %v644_v63 = vsel %vm5276_vm13, %v527_v42, %v643_v50  ;;  %v817_v0 = vor.u32 %v815_v37, %v5491_v44  ;;  %v958_v8 = vld [vmem:[#allocation2 + $0x50] sm:$0xff]  ;;  %v536_v9 = vsel %vm5261_vm12, %v528_v43, %v535_v47  ;;  %v4193_v33 = vpack.c.bf16 %v682_v17, %v682_v17  ;;  %v4547_v37 = vld [vmem:[%s6428_s3 + $0x2e8] ss:$16 sps:$4 sm:$0xff]  }
  0x5a   : > { %645 = vst [vmem:[#allocation2 + $0x60] sm:$0xf] %v644_v63  ;;  %v924_v10 = vsel %vm5276_vm13, %v809_v53, %v923_v55  ;;  %v5513_v18 = vcombine.high %v957_v5, %v958_v8  ;;  %v5515_v20 = vcombine.low %v957_v5, %v958_v8  ;;  %646 = vst [vmem:[#allocation2 + $0x68] sm:$0xf] %v536_v9  ;;  %v541_v28 = vrot.slane %v539_v15, 7  ;;  %v399_v53 = vld [vmem:[%s5191_s27 + $0x60] sm:$0xff] }
  0x5b   : > { %2715 = vmatpush1.bf16.msra.mxu0 %v4530_v26  ;;  %3054 = vmatpush1.bf16.msra.mxu1 %v4533_v30  ;;  %v818_v22 = vsel %vm5261_vm12, %v810_v54, %v817_v0  ;;  %925 = vst [vmem:[#allocation2 + $0x64] sm:$0xf] %v924_v10  ;;  %v542_v26 = vshll.u32 %v4176_v60, 16  ;;  %v550_v30 = vshll.u32 %v4177_v3, 16  ;;  %v5532_v35 = vrot.slane %v547_v29, 7 }
  0x5c   : > { %2716 = vmatprep.subr.bf16.mxu0 %v4540_v38  ;;  %3055 = vmatprep.subr.bf16.mxu1 %v4543_v39  ;;  %926 = vst [vmem:[#allocation2 + $0x6c] sm:$0xf] %v818_v22  ;;  %v545_v34 = vrot.slane %v541_v28, 4  ;;  %v821_v36 = vshrl.u32 %v4192_v31, 16  ;;  %v824_v39 = vshll.u32 %v4192_v31, 16  ;;  %v829_v41 = vshrl.u32 %v4193_v33, 16 }
  0x5d   : > { %2653 = vmatprep.mubr.bf16.mxu0 %v5513_v18  ;;  %2992 = vmatprep.mubr.bf16.mxu1 %v5513_v18  ;;  %v544_v38 = vor.u32 %v542_v26, %v541_v28  ;;  %v832_v42 = vshll.u32 %v4193_v33, 16  ;;  %v4554_v43 = vld [vmem:[%s6428_s3 + $0x304] ss:$16 sps:$4 sm:$0xff]   ;;  %v552_v47 = vor.u32 %v550_v30, %v5532_v35  ;;  %v4178_v60 = vpack.c.bf16 %v399_v53, %v399_v53  ;;  %v4555_v63 = vld [vmem:[%s6428_s3 + $0x308] ss:$16 sps:$4 sm:$0xff]  }
  0x5e   : > { %2654 = vmatmul.mubr.bf16.gmra.mrb[12].mxu0 %v5515_v20  ;;  %2993 = vmatmul.mubr.bf16.gmra.mrb[12].mxu1 %v5515_v20  ;;  %v823_v50 = vrot.slane %v821_v36, 7  ;;  %v5545_v54 = vrot.slane %v829_v41, 7  ;;  %v352_v55 = vld [vmem:[#allocation2 + $0x90] sm:$0x11]  ;;  %v650_v2 = vld [vmem:[#allocation2 + $0x78] sm:$0xf]  ;;  %v4179_v8 = vpack.c.bf16 %v400_v57, %v400_v57 }
  0x5f   : > { %2717 = vmatpush1.bf16.msra.mxu0 %v4538_v61  ;;  %3056 = vmatpush1.bf16.msra.mxu1 %v4541_v62  ;;  %v4552_v62 = vld [vmem:[%s6428_s3 + $0x300] ss:$16 sps:$4 sm:$0xff]   ;;  %v553_v0 = vsel %vm5261_vm12, %v545_v34, %v552_v47  ;;  %v930_v5 = vld [vmem:[#allocation2 + $0x7c] sm:$0xf]  ;;  %v651_v10 = vsel %vm5276_vm13, %v544_v38, %v650_v2  ;;  %v353_v15 = vsel %vm5221_vm7, 0, %v352_v55  ;;  %v556_v17 = vshrl.u32 %v4178_v60, 16 }
  0x60   : > { %2718 = vmatprep.subr.bf16.mxu0 %v4546_v21  ;;  %3057 = vmatprep.subr.bf16.mxu1 %v4549_v27  ;;  %v826_v3 = vor.u32 %v824_v39, %v823_v50  ;;  %v827_v4 = vrot.slane %v823_v50, 4  ;;  %653 = vst [vmem:[#allocation2 + $0x80] sm:$0xf] %v553_v0  ;;  %v834_v14 = vor.u32 %v832_v42, %v5545_v54  ;;  %v683_v21 = vld [vmem:[%s5200_s8 + $0x60] sm:$0xff]  ;;  %v684_v22 = vld [vmem:[%s5200_s8 + $0x68] sm:$0xff]  ;;  %v559_v30 = vshll.u32 %v4178_v60, 16 }
  0x61   : > { %v4560_v28 = vld [vmem:[%s6428_s3 + $0x324] ss:$16 sps:$4 sm:$0xff]   ;;  %652 = vst [vmem:[#allocation2 + $0x78] sm:$0xf] %v651_v10  ;;  %354 = vst [vmem:[#allocation2 + $0x90] sm:$0x11] %v353_v15  ;;  %v4194_v38 = vpack.c.bf16 %v683_v21, %v683_v21  ;;  %v4195_v39 = vpack.c.bf16 %v684_v22, %v684_v22 }
  0x62   : > { %v959_v61 = vld [vmem:[#allocation2 + $0x60] sm:$0xff]  ;;  %v931_v29 = vsel %vm5276_vm13, %v826_v3, %v930_v5  ;;  %v4563_v31 = vld [vmem:[%s6428_s3 + $0x32c] ss:$16 sps:$4 sm:$0xff]   ;;  %v558_v33 = vrot.slane %v556_v17, 7  ;;  %v564_v34 = vshrl.u32 %v4179_v8, 16  ;;  %v567_v36 = vshll.u32 %v4179_v8, 16 }
  0x63   : > { %2719 = vmatpush1.bf16.msra.mxu0 %v4544_v32  ;;  %3058 = vmatpush1.bf16.msra.mxu1 %v4547_v37  ;;  %v960_v9 = vld [vmem:[#allocation2 + $0x68] sm:$0xff]  ;;  %v835_v32 = vsel %vm5261_vm12, %v827_v4, %v834_v14  ;;  %932 = vst [vmem:[#allocation2 + $0x7c] sm:$0xf] %v931_v29  ;;  %v4558_v37 = vld [vmem:[%s6428_s3 + $0x320] ss:$16 sps:$4 sm:$0xff]   ;;  %v838_v50 = vshrl.u32 %v4194_v38, 16 }
  0x64   : > { %v5563_v26 = vcombine.high %v959_v61, %v960_v9  ;;  %v5565_v27 = vcombine.low %v959_v61, %v960_v9  ;;  %2720 = vmatprep.subr.bf16.mxu0 %v4554_v43  ;;  %3059 = vmatprep.subr.bf16.mxu1 %v4557_v46  ;;  %933 = vst [vmem:[#allocation2 + $0x84] sm:$0xf] %v835_v32  ;;  %v4561_v41 = vld [vmem:[%s6428_s3 + $0x328] ss:$16 sps:$4 sm:$0xff]   ;;  %v562_v43 = vrot.slane %v558_v33, 4  ;;  %v5587_v46 = vrot.slane %v564_v34, 7 }
  0x65   : > { %v561_v42 = vor.u32 %v559_v30, %v558_v33  ;;  %v4568_v47 = vld [vmem:[%s6428_s3 + $0x344] ss:$16 sps:$4 sm:$0xff]   ;;  %v841_v53 = vshll.u32 %v4194_v38, 16  ;;  %v846_v55 = vshrl.u32 %v4195_v39, 16  ;;  %v849_v57 = vshll.u32 %v4195_v39, 16  ;;  %v402_v22 = vld [vmem:[%s5191_s27 + $0x78] sm:$0xff] }
  0x66   : > { %2663 = vmatprep.mubr.bf16.mxu0 %v5563_v26  ;;  %3002 = vmatprep.mubr.bf16.mxu1 %v5563_v26  ;;  %v4571_v60 = vld [vmem:[%s6428_s3 + $0x34c] ss:$16 sps:$4 sm:$0xff]   ;;  %v569_v61 = vor.u32 %v567_v36, %v5587_v46  ;;  %v840_v0 = vrot.slane %v838_v50, 7  ;;  %v401_v8 = vld [vmem:[%s5191_s27 + $0x70] sm:$0xff]  ;;  %v4569_v14 = vld [vmem:[%s6428_s3 + $0x348] ss:$16 sps:$4 sm:$0xff]  }
  0x67   : > { %2664 = vmatmul.mubr.bf16.gmra.mrb[16].mxu0 %v5565_v27  ;;  %3003 = vmatmul.mubr.bf16.gmra.mrb[16].mxu1 %v5565_v27  ;;  %v4566_v10 = vld [vmem:[%s6428_s3 + $0x340] ss:$16 sps:$4 sm:$0xff]   ;;  %v4180_v30 = vpack.c.bf16 %v401_v8, %v401_v8  ;;  %v686_v32 = vld [vmem:[%s5200_s8 + $0x78] sm:$0xff] }
  0x68   : > { %2721 = vmatpush1.bf16.msra.mxu0 %v4552_v62  ;;  %3060 = vmatpush1.bf16.msra.mxu1 %v4555_v63  ;;  %v5596_v62 = vrot.slane %v846_v55, 7  ;;  %v355_v63 = vld [vmem:[#allocation2 + $0xa8] sm:$0x11]  ;;  %v570_v2 = vsel %vm5261_vm12, %v562_v43, %v569_v61  ;;  %v657_v3 = vld [vmem:[#allocation2 + $0x90] sm:$0xf]  ;;  %v843_v17 = vor.u32 %v841_v53, %v840_v0  ;;  %v844_v52 = vrot.slane %v840_v0, 4 }
  0x69   : > { %2722 = vmatprep.subr.bf16.mxu0 %v4560_v28  ;;  %3061 = vmatprep.subr.bf16.mxu1 %v4563_v31  ;;  %v937_v4 = vld [vmem:[#allocation2 + $0x94] sm:$0xf]  ;;  %v356_v5 = vsel %vm5221_vm7, 0, %v355_v63  ;;  %v658_v15 = vsel %vm5276_vm13, %v561_v42, %v657_v3  ;;  %660 = vst [vmem:[#allocation2 + $0x98] sm:$0xf] %v570_v2  ;;  %v4181_v31 = vpack.c.bf16 %v402_v22, %v402_v22  ;;  %v573_v42 = vshrl.u32 %v4180_v30, 16 }
  0x6a   : > { %v961_v9 = vld [vmem:[#allocation2 + $0x78] sm:$0xff]  ;;  %v851_v21 = vor.u32 %v849_v57, %v5596_v62  ;;  %357 = vst [vmem:[#allocation2 + $0xa8] sm:$0x11] %v356_v5  ;;  %v685_v28 = vld [vmem:[%s5200_s8 + $0x70] sm:$0xff]  ;;  %659 = vst [vmem:[#allocation2 + $0x90] sm:$0xf] %v658_v15  ;;  %v4197_v57 = vpack.c.bf16 %v686_v32, %v686_v32 }
  0x6b   : > { %v962_v29 = vld [vmem:[#allocation2 + $0x80] sm:$0xff]  ;;  %v4196_v33 = vpack.c.bf16 %v685_v28, %v685_v28  ;;  %v4577_v38 = vld [vmem:[%s6428_s3 + $0x36c] ss:$16 sps:$4 sm:$0xff]   ;;  %v576_v43 = vshll.u32 %v4180_v30, 16  ;;  %v584_v50 = vshll.u32 %v4181_v31, 16  ;;  %v575_v63 = vrot.slane %v573_v42, 7 }
  0x6c   : > { %2723 = vmatpush1.bf16.msra.mxu0 %v4558_v37  ;;  %3062 = vmatpush1.bf16.msra.mxu1 %v4561_v41  ;;  %v5615_v34 = vcombine.high %v961_v9, %v962_v29  ;;  %v5617_v36 = vcombine.low %v961_v9, %v962_v29  ;;  %v4574_v37 = vld [vmem:[%s6428_s3 + $0x364] ss:$16 sps:$4 sm:$0xff]   ;;  %v852_v39 = vsel %vm5261_vm12, %v844_v52, %v851_v21  ;;  %v4572_v53 = vld [vmem:[%s6428_s3 + $0x360] ss:$16 sps:$4 sm:$0xff]   ;;  %v4575_v55 = vld [vmem:[%s6428_s3 + $0x368] ss:$16 sps:$4 sm:$0xff]  }
  0x6d   : > { %2724 = vmatprep.subr.bf16.mxu0 %v4568_v47  ;;  %3063 = vmatprep.subr.bf16.mxu1 %v4571_v60  ;;  %v938_v41 = vsel %vm5276_vm13, %v843_v17, %v937_v4  ;;  %940 = vst [vmem:[#allocation2 + $0x9c] sm:$0xf] %v852_v39  ;;  %v581_v47 = vshrl.u32 %v4181_v31, 16  ;;  %v855_v60 = vshrl.u32 %v4196_v33, 16  ;;  %v858_v61 = vshll.u32 %v4196_v33, 16 }
  0x6e   : > { %939 = vst [vmem:[#allocation2 + $0x94] sm:$0xf] %v938_v41  ;;  %2673 = vmatprep.mubr.bf16.mxu0 %v5615_v34  ;;  %3012 = vmatprep.mubr.bf16.mxu1 %v5615_v34  ;;  %v4582_v0 = vld [vmem:[%s6428_s3 + $0x384] ss:$16 sps:$4 sm:$0xff]   ;;  %v4585_v3 = vld [vmem:[%s6428_s3 + $0x38c] ss:$16 sps:$4 sm:$0xff]   ;;  %v578_v9 = vor.u32 %v576_v43, %v575_v63 }
  0x6f   : > { %2674 = vmatmul.mubr.bf16.gmra.mrb[20].mxu0 %v5617_v36  ;;  %3013 = vmatmul.mubr.bf16.gmra.mrb[20].mxu1 %v5617_v36  ;;  %v5642_v2 = vrot.slane %v581_v47, 7  ;;  %v857_v4 = vrot.slane %v855_v60, 7  ;;  %v863_v5 = vshrl.u32 %v4197_v57, 16  ;;  %v866_v8 = vshll.u32 %v4197_v57, 16  ;;  %v363_v30 = vld [vmem:[#allocation2 + $0x10] sm:$0x11] }
  0x70   : > { %2725 = vmatpush1.bf16.msra.mxu0 %v4566_v10  ;;  %3064 = vmatpush1.bf16.msra.mxu1 %v4569_v14  ;;  %v579_v15 = vrot.slane %v575_v63, 4  ;;  %v4580_v33 = vld [vmem:[%s6428_s3 + $0x380] ss:$16 sps:$4 sm:$0xff]   ;;  %v364_v39 = vsel %vm5317_vm15, 0, %v363_v30  ;;  %v4583_v43 = vld [vmem:[%s6428_s3 + $0x388] ss:$16 sps:$4 sm:$0xff]  }
  0x71   : > { %2726 = vmatprep.subr.bf16.mxu0 %v4574_v37  ;;  %3065 = vmatprep.subr.bf16.mxu1 %v4577_v38  ;;  %v586_v17 = vor.u32 %v584_v50, %v5642_v2  ;;  %v664_v52 = vld [vmem:[#allocation2 + $0xa8] sm:$0xf]  ;;  %v944_v21 = vld [vmem:[#allocation2 + $0xac] sm:$0xf]  ;;  %v860_v22 = vor.u32 %v858_v61, %v857_v4  ;;  %v861_v28 = vrot.slane %v857_v4, 4  ;;  %v5648_v29 = vrot.slane %v863_v5, 7 }
  0x72   : > { %v665_v14 = vsel %vm5276_vm13, %v578_v9, %v664_v52  ;;  %365 = vst [vmem:[#allocation2 + $0x10] sm:$0x11] %v364_v39  ;;  %v4591_v47 = vld [vmem:[%s6428_s3 + $0x3ac] ss:$16 sps:$4 sm:$0xff]   ;;  %v751_v57 = vrot.slane %v5265_v19, 4  ;;  %v1107_v52 = vshll.u32 %v5352_v25, 16 }
  0x73   : > { %v587_v10 = vsel %vm5261_vm12, %v579_v15, %v586_v17  ;;  %666 = vst [vmem:[#allocation2 + $0xa8] sm:$0xf] %v665_v14  ;;  %v868_v37 = vor.u32 %v866_v8, %v5648_v29  ;;  %v945_v38 = vsel %vm5276_vm13, %v860_v22, %v944_v21  ;;  %v366_v60 = vld [vmem:[#allocation2 + $0x28] sm:$0x11]  ;;  %v4596_v61 = vld [vmem:[%s6428_s3 + $0x3c4] ss:$16 sps:$4 sm:$0xff]  }
  0x74   : > { %2727 = vmatpush1.bf16.msra.mxu0 %v4572_v53  ;;  %3066 = vmatpush1.bf16.msra.mxu1 %v4575_v55  ;;  %v964_v32 = vld [vmem:[#allocation2 + $0x98] sm:$0xff]  ;;  %667 = vst [vmem:[#allocation2 + $0xb0] sm:$0xf] %v587_v10  ;;  %946 = vst [vmem:[#allocation2 + $0xac] sm:$0xf] %v945_v38  ;;  %v469_v55 = vrot.slane %v5251_v12, 4 }
  0x75   : > { %v963_v31 = vld [vmem:[#allocation2 + $0x90] sm:$0xff]  ;;  %2728 = vmatprep.subr.bf16.mxu0 %v4582_v0  ;;  %3067 = vmatprep.subr.bf16.mxu1 %v4585_v3  ;;  %v869_v50 = vsel %vm5261_vm12, %v861_v28, %v868_v37  ;;  %v4599_v0 = vld [vmem:[%s6428_s3 + $0x3cc] ss:$16 sps:$4 sm:$0xff]   ;;  %v367_v12 = vsel %vm5317_vm15, 0, %v366_v60  ;;  %v1119_v8 = vshll.u32 %v5350_v24, 16  ;;  %v486_v10 = vrot.slane %v5321_v59, 4 }
  0x76   : > { %v5662_v41 = vcombine.high %v963_v31, %v964_v32  ;;  %v5664_v42 = vcombine.low %v963_v31, %v964_v32  ;;  %947 = vst [vmem:[#allocation2 + $0xb4] sm:$0xf] %v869_v50  ;;  %v4586_v53 = vld [vmem:[%s6428_s3 + $0x3a0] ss:$16 sps:$4 sm:$0xff]   ;;  %368 = vst [vmem:[#allocation2 + $0x28] sm:$0x11] %v367_v12 }
  0x77   : > { %v4594_v15 = vld [vmem:[%s6428_s3 + $0x3c0] ss:$16 sps:$4 sm:$0xff]   ;;  %v4597_v17 = vld [vmem:[%s6428_s3 + $0x3c8] ss:$16 sps:$4 sm:$0xff]   ;;  %v4602_v28 = vld [vmem:[%s6428_s3 + $0x3e4] ss:$16 sps:$4 sm:$0xff]  }
  0x78   : > { %2683 = vmatprep.mubr.bf16.mxu0 %v5662_v41  ;;  %3022 = vmatprep.mubr.bf16.mxu1 %v5662_v41  ;;  %v768_v14 = vrot.slane %v5326_v1, 4  ;;  %v4605_v30 = vld [vmem:[%s6428_s3 + $0x3ec] ss:$16 sps:$4 sm:$0xff]   ;;  %v369_v31 = vld [vmem:[#allocation2 + $0x40] sm:$0x11]  ;;  %v1121_v37 = vrot.slane %v1119_v8, 1 }
  0x79   : > { %2684 = vmatmul.mubr.bf16.gmra.mrb[24].mxu0 %v5664_v42  ;;  %3023 = vmatmul.mubr.bf16.gmra.mrb[24].mxu1 %v5664_v42  ;;  %v619_v3 = vld [vmem:[#allocation2 + $0x10] sm:$0x1]  ;;  %v899_v4 = vld [vmem:[#allocation2 + $0x14] sm:$0x1]  ;;  %v370_v59 = vsel %vm5317_vm15, 0, %v369_v31  ;;  %v1105_v1 = vshrl.u32 %v5352_v25, 16 }
  0x7a   : > { %2729 = vmatpush1.bf16.msra.mxu0 %v4580_v33  ;;  %3068 = vmatpush1.bf16.msra.mxu1 %v4583_v43  ;;  %v620_v19 = vsel %vm5210_vm4, %v469_v55, %v619_v3  ;;  %v900_v5 = vsel %vm5210_vm4, %v751_v57, %v899_v4  ;;  %v4600_v32 = vld [vmem:[%s6428_s3 + $0x3e0] ss:$16 sps:$4 sm:$0xff]   ;;  %v1117_v33 = vshrl.u32 %v5350_v24, 16  ;;  %371 = vst [vmem:[#allocation2 + $0x40] sm:$0x11] %v370_v59  ;;  %v1109_v24 = vrot.slane %v1107_v52, 1 }
  0x7b   : > { %2730 = vmatprep.subr.bf16.mxu0 %v4588_v23  ;;  %3069 = vmatprep.subr.bf16.mxu1 %v4591_v47  ;;  %v965_v63 = vld [vmem:[#allocation2 + $0xa8] sm:$0xff]  ;;  %621 = vst [vmem:[#allocation2 + $0x10] sm:$0x1] %v620_v19  ;;  %901 = vst [vmem:[#allocation2 + $0x14] sm:$0x1] %v900_v5  ;;  %v1143_v55 = vshll.u32 %v5407_v11, 16 }
  0x7c   : > { %v4603_v43 = vld [vmem:[%s6428_s3 + $0x3e8] ss:$16 sps:$4 sm:$0xff]   ;;  %v4610_v23 = vld [vmem:[%s6428_s3 + $0x404] ss:$16 sps:$4 sm:$0xff]   ;;  %v4613_v50 = vld [vmem:[%s6428_s3 + $0x40c] ss:$16 sps:$4 sm:$0xff]   ;;  %v1110_v12 = vor.u32 %v1109_v24, %v1105_v1 }
  0x7d   : > { %v5702_v9 = vld [vmem:[#allocation2 + $0xb0] sm:$0xff]  ;;  %v626_v38 = vld [vmem:[#allocation2 + $0x28] sm:$0x1]  ;;  %v906_v39 = vld [vmem:[#allocation2 + $0x2c] sm:$0x1]  ;;  %v503_v60 = vrot.slane %v5382_v51, 4 }
  0x7e   : > { %2731 = vmatpush1.bf16.msra.mxu0 %v4586_v53  ;;  %3070 = vmatpush1.bf16.msra.mxu1 %v4589_v16  ;;  %v5712_v21 = vcombine.high %v965_v63, %v5702_v9  ;;  %v5715_v22 = vcombine.low %v965_v63, %v5702_v9  ;;  %v627_v47 = vsel %vm5210_vm4, %v486_v10, %v626_v38  ;;  %v1131_v63 = vshll.u32 %v5409_v13, 16  ;;  %v372_v3 = vld [vmem:[#allocation2 + $0x58] sm:$0x11]  ;;  %v4608_v10 = vld [vmem:[%s6428_s3 + $0x400] ss:$16 sps:$4 sm:$0xff]  }
  0x7f   : > { %2732 = vmatprep.subr.bf16.mxu0 %v4596_v61  ;;  %3071 = vmatprep.subr.bf16.mxu1 %v4599_v0  ;;  %v907_v25 = vsel %vm5210_vm4, %v768_v14, %v906_v39  ;;  %628 = vst [vmem:[#allocation2 + $0x28] sm:$0x1] %v627_v47  ;;  %v785_v61 = vrot.slane %v5387_v56, 4  ;;  %v1122_v0 = vor.u32 %v1121_v37, %v1117_v33  ;;  %v1141_v5 = vshrl.u32 %v5407_v11, 16  ;;  %v4616_v37 = vld [vmem:[%s6428_s3 + $0x424] ss:$16 sps:$4 sm:$0xff]  }
  0x80   : > { %2693 = vmatprep.mubr.bf16.mxu0 %v5712_v21  ;;  %3032 = vmatprep.mubr.bf16.mxu1 %v5712_v21  ;;  %908 = vst [vmem:[#allocation2 + $0x2c] sm:$0x1] %v907_v25  ;;  %v373_v51 = vsel %vm5317_vm15, 0, %v372_v3  ;;  %v1145_v8 = vrot.slane %v1143_v55, 1  ;;  %v1129_v56 = vshrl.u32 %v5409_v13, 16  ;;  %v1133_v31 = vrot.slane %v1131_v63, 1 }
  0x81   : > { %2694 = vmatmul.mubr.bf16.gmra.mrb[28].mxu0 %v5715_v22  ;;  %3033 = vmatmul.mubr.bf16.gmra.mrb[28].mxu1 %v5715_v22  ;;  %374 = vst [vmem:[#allocation2 + $0x58] sm:$0x11] %v373_v51  ;;  %v4619_v59 = vld [vmem:[%s6428_s3 + $0x42c] ss:$16 sps:$4 sm:$0xff]   ;;  %v4614_v39 = vld [vmem:[%s6428_s3 + $0x420] ss:$16 sps:$4 sm:$0xff]  }
  0x82   : > { %2733 = vmatpush1.bf16.msra.mxu0 %v4594_v15  ;;  %3072 = vmatpush1.bf16.msra.mxu1 %v4597_v17  ;;  %v967_v53 = vld [vmem:[#allocation2 + $0x10] sm:$0x11]  ;;  %v633_v15 = vld [vmem:[#allocation2 + $0x40] sm:$0x1]  ;;  %v913_v17 = vld [vmem:[#allocation2 + $0x44] sm:$0x1]  ;;  %v1146_v25 = vor.u32 %v1145_v8, %v1141_v5 }
  0x83   : > { %2734 = vmatprep.subr.bf16.mxu0 %v4602_v28  ;;  %3073 = vmatprep.subr.bf16.mxu1 %v4605_v30  ;;  %v5750_v16 = vcombine.low %v967_v53, %v967_v53  ;;  %v5752_v57 = vcombine.high %v967_v53, %v967_v53  ;;  %v634_v14 = vsel %vm5210_vm4, %v503_v60, %v633_v15  ;;  %v4611_v30 = vld [vmem:[%s6428_s3 + $0x408] ss:$16 sps:$4 sm:$0xff]   ;;  %v1167_v24 = vshll.u32 %v5455_v6, 16  ;;  %v375_v55 = vld [vmem:[#allocation2 + $0x70] sm:$0x11] }
  0x84   : > { %v914_v11 = vsel %vm5210_vm4, %v785_v61, %v913_v17  ;;  %635 = vst [vmem:[#allocation2 + $0x40] sm:$0x1] %v634_v14  ;;  %v802_v47 = vrot.slane %v5439_v49, 4  ;;  %v1134_v60 = vor.u32 %v1133_v31, %v1129_v56  ;;  %v4624_v61 = vld [vmem:[%s6428_s3 + $0x444] ss:$16 sps:$4 sm:$0xff]   ;;  %v1165_v5 = vshrl.u32 %v5455_v6, 16 }
  0x85   : > { %v1124_v4 = vshll.u32 %v5752_v57, 16  ;;  %v1112_v19 = vshll.u32 %v5750_v16, 16  ;;  %915 = vst [vmem:[#allocation2 + $0x44] sm:$0x1] %v914_v11  ;;  %v1169_v51 = vrot.slane %v1167_v24, 1  ;;  %v537_v31 = vrot.slane %v5489_v40, 4 }
  0x86   : > { %2735 = vmatpush1.bf16.msra.mxu0 %v4600_v32  ;;  %3074 = vmatpush1.bf16.msra.mxu1 %v4603_v43  ;;  %v4617_v43 = vld [vmem:[%s6428_s3 + $0x428] ss:$16 sps:$4 sm:$0xff]   ;;  %v4633_v14 = vld [vmem:[%s6428_s3 + $0x46c] ss:$16 sps:$4 sm:$0xff]   ;;  %v1189_v40 = vshrl.u32 %v5513_v18, 16 }
  0x87   : > { %2817 = vmatprep.subr.bf16.mxu0 %v4610_v23  ;;  %3156 = vmatprep.subr.bf16.mxu1 %v4613_v50  ;;  %v1126_v52 = vrot.slane %v1124_v4, 1  ;;  %v1114_v28 = vrot.slane %v1112_v19, 1  ;;  %v968_v13 = vld [vmem:[#allocation2 + $0x28] sm:$0x11]  ;;  %v520_v23 = vrot.slane %v5437_v45, 4  ;;  %v376_v45 = vsel %vm5317_vm15, 0, %v375_v55 }
  0x88   : > { %v5781_v1 = vcombine.high %v968_v13, %v968_v13  ;;  %v5783_v38 = vcombine.low %v968_v13, %v968_v13  ;;  %v640_v63 = vld [vmem:[#allocation2 + $0x58] sm:$0x1]  ;;  %v920_v3 = vld [vmem:[#allocation2 + $0x5c] sm:$0x1]  ;;  %377 = vst [vmem:[#allocation2 + $0x70] sm:$0x11] %v376_v45 }
  0x89   : > { %v1127_v32 = vsel %vm1103_vm0, %v1122_v0, %v1126_v52  ;;  %v1115_v33 = vsel %vm1103_vm0, %v1110_v12, %v1114_v28  ;;  %v1155_v0 = vshll.u32 %v5457_v7, 16  ;;  %v4622_v4 = vld [vmem:[%s6428_s3 + $0x440] ss:$16 sps:$4 sm:$0xff]   ;;  %v4627_v19 = vld [vmem:[%s6428_s3 + $0x44c] ss:$16 sps:$4 sm:$0xff]   ;;  %v641_v8 = vsel %vm5210_vm4, %v520_v23, %v640_v63 }
  0x8a   : > { %2736 = vmatprep.mubr.bf16.mxu0 %v1127_v32  ;;  %3075 = vmatprep.mubr.bf16.mxu1 %v1127_v32  ;;  %v1148_v50 = vshll.u32 %v5781_v1, 16  ;;  %v1136_v53 = vshll.u32 %v5783_v38, 16  ;;  %v921_v56 = vsel %vm5210_vm4, %v802_v47, %v920_v3  ;;  %v4625_v17 = vld [vmem:[%s6428_s3 + $0x448] ss:$16 sps:$4 sm:$0xff]   ;;  %v1153_v28 = vshrl.u32 %v5457_v7, 16 }
  0x8b   : > { %2737 = vmatmul.mubr.bf16.vlgmr.msra.gmra.mrb[0].mxu0 %v1115_v33  ;;  %3076 = vmatmul.mubr.bf16.vlgmr.msra.gmra.mrb[0].mxu1 %v1115_v33  ;;  %642 = vst [vmem:[#allocation2 + $0x58] sm:$0x1] %v641_v8  ;;  %922 = vst [vmem:[#allocation2 + $0x5c] sm:$0x1] %v921_v56  ;;  %v1157_v13 = vrot.slane %v1155_v0, 1  ;;  %v1191_v7 = vshll.u32 %v5513_v18, 16 }
  0x8c   : > { %2818 = vmatpush1.bf16.msra.mxu0 %v4608_v10  ;;  %3157 = vmatpush1.bf16.msra.mxu1 %v4611_v30  ;;  %v1150_v49 = vrot.slane %v1148_v50, 1  ;;  %v1138_v12 = vrot.slane %v1136_v53, 1  ;;  %v969_v52 = vld [vmem:[#allocation2 + $0x40] sm:$0x11]  ;;  %v819_v32 = vrot.slane %v5491_v44, 4  ;;  %v1179_v44 = vshll.u32 %v5515_v20, 16 }
  0x8d   : > { %2819 = vmatprep.subr.bf16.mxu0 %v4616_v37  ;;  %3158 = vmatprep.subr.bf16.mxu1 %v4619_v59  ;;  %v4630_v10 = vld [vmem:[%s6428_s3 + $0x464] ss:$16 sps:$4 sm:$0xff]   ;;  %v5825_v11 = vcombine.high %v969_v52, %v969_v52  ;;  %v5827_v30 = vcombine.low %v969_v52, %v969_v52  ;;  %v4628_v33 = vld [vmem:[%s6428_s3 + $0x460] ss:$16 sps:$4 sm:$0xff]   ;;  %v4631_v37 = vld [vmem:[%s6428_s3 + $0x468] ss:$16 sps:$4 sm:$0xff]   ;;  %v1170_v59 = vor.u32 %v1169_v51, %v1165_v5 }
  0x8e   : > { %v1151_v15 = vsel %vm1103_vm0, %v1146_v25, %v1150_v49  ;;  %v1139_v6 = vsel %vm1103_vm0, %v1134_v60, %v1138_v12  ;;  %v378_v24 = vld [vmem:[#allocation2 + $0x88] sm:$0x11]  ;;  %v1158_v25 = vor.u32 %v1157_v13, %v1153_v28  ;;  %v4638_v60 = vld [vmem:[%s6428_s3 + $0x484] ss:$16 sps:$4 sm:$0xff]   ;;  %v1215_v63 = vshll.u32 %v5563_v26, 16 }
  0x8f   : > { %2746 = vmatprep.mubr.bf16.mxu0 %v1151_v15  ;;  %3085 = vmatprep.mubr.bf16.mxu1 %v1151_v15  ;;  %v379_v23 = vsel %vm5317_vm15, 0, %v378_v24  ;;  %v647_v53 = vld [vmem:[#allocation2 + $0x70] sm:$0x1]  ;;  %v927_v55 = vld [vmem:[#allocation2 + $0x74] sm:$0x1]  ;;  %v1177_v5 = vshrl.u32 %v5515_v20, 16 }
  0x90   : > { %2820 = vmatpush1.bf16.msra.mxu0 %v4614_v39  ;;  %3159 = vmatpush1.bf16.msra.mxu1 %v4617_v43  ;;  %v1172_v39 = vshll.u32 %v5825_v11, 16  ;;  %v1160_v43 = vshll.u32 %v5827_v30, 16  ;;  %380 = vst [vmem:[#allocation2 + $0x88] sm:$0x11] %v379_v23  ;;  %v4641_v18 = vld [vmem:[%s6428_s3 + $0x48c] ss:$16 sps:$4 sm:$0xff]   ;;  %v648_v0 = vsel %vm5210_vm4, %v537_v31, %v647_v53  ;;  %v928_v45 = vsel %vm5210_vm4, %v819_v32, %v927_v55 }
  0x91   : > { %2821 = vmatprep.subr.bf16.mxu0 %v4624_v61  ;;  %3160 = vmatprep.subr.bf16.mxu1 %v4627_v19  ;;  %v1193_v61 = vrot.slane %v1191_v7, 1  ;;  %649 = vst [vmem:[#allocation2 + $0x70] sm:$0x1] %v648_v0  ;;  %929 = vst [vmem:[#allocation2 + $0x74] sm:$0x1] %v928_v45  ;;  %v1181_v51 = vrot.slane %v1179_v44, 1 }
  0x92   : > { %v1174_v47 = vrot.slane %v1172_v39, 1  ;;  %v1162_v50 = vrot.slane %v1160_v43, 1  ;;  %v970_v12 = vld [vmem:[#allocation2 + $0x58] sm:$0x11]  ;;  %v4636_v3 = vld [vmem:[%s6428_s3 + $0x480] ss:$16 sps:$4 sm:$0xff]  }
  0x93   : > { %2747 = vmatmul.mubr.bf16.gmra.mrb[4].mxu0 %v1139_v6  ;;  %3086 = vmatmul.mubr.bf16.gmra.mrb[4].mxu1 %v1139_v6  ;;  %v5861_v19 = vcombine.low %v970_v12, %v970_v12  ;;  %v4639_v56 = vld [vmem:[%s6428_s3 + $0x488] ss:$16 sps:$4 sm:$0xff]   ;;  %v554_v15 = vrot.slane %v5532_v35, 4  ;;  %v4644_v52 = vld [vmem:[%s6428_s3 + $0x4a4] ss:$16 sps:$4 sm:$0xff]   ;;  %v1194_v28 = vor.u32 %v1193_v61, %v1189_v40  ;;  %v1217_v13 = vrot.slane %v1215_v63, 1 }
  0x94   : > { %2822 = vmatpush1.bf16.msra.mxu0 %v4622_v4  ;;  %3161 = vmatpush1.bf16.msra.mxu1 %v4625_v17  ;;  %v1175_v49 = vsel %vm1103_vm0, %v1170_v59, %v1174_v47  ;;  %v5859_v4 = vcombine.high %v970_v12, %v970_v12  ;;  %v1163_v8 = vsel %vm1103_vm0, %v1158_v25, %v1162_v50  ;;  %v836_v17 = vrot.slane %v5545_v54, 4  ;;  %v4647_v20 = vld [vmem:[%s6428_s3 + $0x4ac] ss:$16 sps:$4 sm:$0xff]   ;;  %v4642_v35 = vld [vmem:[%s6428_s3 + $0x4a0] ss:$16 sps:$4 sm:$0xff]  }
  0x95   : > { %2823 = vmatprep.subr.bf16.mxu0 %v4630_v10  ;;  %3162 = vmatprep.subr.bf16.mxu1 %v4633_v14  ;;  %v1184_v10 = vshll.u32 %v5861_v19, 16  ;;  %v4645_v54 = vld [vmem:[%s6428_s3 + $0x4a8] ss:$16 sps:$4 sm:$0xff]   ;;  %v1213_v14 = vshrl.u32 %v5563_v26, 16  ;;  %v381_v7 = vld [vmem:[#allocation2 + $0xa0] sm:$0x11]  ;;  %v1182_v32 = vor.u32 %v1181_v51, %v1177_v5 }
  0x96   : > { %2756 = vmatprep.mubr.bf16.mxu0 %v1175_v49  ;;  %3095 = vmatprep.mubr.bf16.mxu1 %v1175_v49  ;;  %v1196_v6 = vshll.u32 %v5859_v4, 16  ;;  %v4652_v43 = vld [vmem:[%s6428_s3 + $0x4c4] ss:$16 sps:$4 sm:$0xff]   ;;  %v382_v40 = vsel %vm5317_vm15, 0, %v381_v7  ;;  %v4655_v23 = vld [vmem:[%s6428_s3 + $0x4cc] ss:$16 sps:$4 sm:$0xff]  }
  0x97   : > { %v934_v59 = vld [vmem:[#allocation2 + $0x8c] sm:$0x1]  ;;  %v1186_v39 = vrot.slane %v1184_v10, 1  ;;  %383 = vst [vmem:[#allocation2 + $0xa0] sm:$0x11] %v382_v40  ;;  %v1201_v61 = vshrl.u32 %v5565_v27, 16 }
  0x98   : > { %2824 = vmatpush1.bf16.msra.mxu0 %v4628_v33  ;;  %3163 = vmatpush1.bf16.msra.mxu1 %v4631_v37  ;;  %v1198_v31 = vrot.slane %v1196_v6, 1  ;;  %v1203_v33 = vshll.u32 %v5565_v27, 16  ;;  %v654_v37 = vld [vmem:[#allocation2 + $0x88] sm:$0x1]  ;;  %v935_v24 = vsel %vm5210_vm4, %v836_v17, %v934_v59  ;;  %v971_v47 = vld [vmem:[#allocation2 + $0x70] sm:$0x11] }
  0x99   : > { %2825 = vmatprep.subr.bf16.mxu0 %v4638_v60  ;;  %3164 = vmatprep.subr.bf16.mxu1 %v4641_v18  ;;  %v655_v26 = vsel %vm5210_vm4, %v554_v15, %v654_v37  ;;  %936 = vst [vmem:[#allocation2 + $0x8c] sm:$0x1] %v935_v24  ;;  %v4650_v25 = vld [vmem:[%s6428_s3 + $0x4c0] ss:$16 sps:$4 sm:$0xff]   ;;  %v4653_v50 = vld [vmem:[%s6428_s3 + $0x4c8] ss:$16 sps:$4 sm:$0xff]   ;;  %v5905_v53 = vcombine.high %v971_v47, %v971_v47 }
  0x9a   : > { %v1199_v44 = vsel %vm1103_vm0, %v1194_v28, %v1198_v31  ;;  %656 = vst [vmem:[#allocation2 + $0x88] sm:$0x1] %v655_v26  ;;  %v5907_v55 = vcombine.low %v971_v47, %v971_v47  ;;  %v4658_v60 = vld [vmem:[%s6428_s3 + $0x4e4] ss:$16 sps:$4 sm:$0xff]   ;;  %v1218_v18 = vor.u32 %v1217_v13, %v1213_v14  ;;  %v1239_v0 = vshll.u32 %v5615_v34, 16 }
  0x9b   : > { %2757 = vmatmul.mubr.bf16.gmra.mrb[8].mxu0 %v1163_v8  ;;  %3096 = vmatmul.mubr.bf16.gmra.mrb[8].mxu1 %v1163_v8  ;;  %v1187_v45 = vsel %vm1103_vm0, %v1182_v32, %v1186_v39  ;;  %v1220_v49 = vshll.u32 %v5905_v53, 16  ;;  %v1205_v12 = vrot.slane %v1203_v33, 1  ;;  %v571_v5 = vrot.slane %v5587_v46, 4  ;;  %v384_v27 = vld [vmem:[#allocation2 + $0xb8] sm:$0x11] }
  0x9c   : > { %2826 = vmatpush1.bf16.msra.mxu0 %v4636_v3  ;;  %3165 = vmatpush1.bf16.msra.mxu1 %v4639_v56  ;;  %v1208_v63 = vshll.u32 %v5907_v55, 16  ;;  %v4661_v3 = vld [vmem:[%s6428_s3 + $0x4ec] ss:$16 sps:$4 sm:$0xff]   ;;  %v4656_v51 = vld [vmem:[%s6428_s3 + $0x4e0] ss:$16 sps:$4 sm:$0xff]   ;;  %v853_v15 = vrot.slane %v5596_v62, 4 }
  0x9d   : > { %2827 = vmatprep.subr.bf16.mxu0 %v4644_v52  ;;  %3166 = vmatprep.subr.bf16.mxu1 %v4647_v20  ;;  %v4659_v8 = vld [vmem:[%s6428_s3 + $0x4e8] ss:$16 sps:$4 sm:$0xff]   ;;  %v1222_v56 = vrot.slane %v1220_v49, 1  ;;  %v385_v17 = vsel %vm5317_vm15, 0, %v384_v27  ;;  %v4666_v46 = vld [vmem:[%s6428_s3 + $0x504] ss:$16 sps:$4 sm:$0xff]   ;;  %v1206_v10 = vor.u32 %v1205_v12, %v1201_v61 }
  0x9e   : > { %2766 = vmatprep.mubr.bf16.mxu0 %v1199_v44  ;;  %3105 = vmatprep.mubr.bf16.mxu1 %v1199_v44  ;;  %v1210_v52 = vrot.slane %v1208_v63, 1  ;;  %v1237_v20 = vshrl.u32 %v5615_v34, 16  ;;  %v1241_v28 = vrot.slane %v1239_v0, 1  ;;  %v1227_v6 = vshll.u32 %v5617_v36, 16  ;;  %386 = vst [vmem:[#allocation2 + $0xb8] sm:$0x11] %v385_v17 }
  0x9f   : > { %v1223_v62 = vsel %vm1103_vm0, %v1218_v18, %v1222_v56  ;;  %v4669_v14 = vld [vmem:[%s6428_s3 + $0x50c] ss:$16 sps:$4 sm:$0xff]   ;;  %v4664_v31 = vld [vmem:[%s6428_s3 + $0x500] ss:$16 sps:$4 sm:$0xff]   ;;  %v4667_v33 = vld [vmem:[%s6428_s3 + $0x508] ss:$16 sps:$4 sm:$0xff]  }
  0xa0   : > { %2828 = vmatpush1.bf16.msra.mxu0 %v4642_v35  ;;  %3167 = vmatpush1.bf16.msra.mxu1 %v4645_v54  ;;  %v661_v35 = vld [vmem:[#allocation2 + $0xa0] sm:$0x1]  ;;  %v941_v54 = vld [vmem:[#allocation2 + $0xa4] sm:$0x1]  ;;  %v1242_v37 = vor.u32 %v1241_v28, %v1237_v20  ;;  %v1225_v39 = vshrl.u32 %v5617_v36, 16  ;;  %v1211_v26 = vsel %vm1103_vm0, %v1206_v10, %v1210_v52  ;;  %v1229_v24 = vrot.slane %v1227_v6, 1 }
  0xa1   : > { %2829 = vmatprep.subr.bf16.mxu0 %v4652_v43  ;;  %3168 = vmatprep.subr.bf16.mxu1 %v4655_v23  ;;  %v972_v58 = vld [vmem:[#allocation2 + $0x88] sm:$0x11]  ;;  %v662_v7 = vsel %vm5210_vm4, %v571_v5, %v661_v35  ;;  %v942_v32 = vsel %vm5210_vm4, %v853_v15, %v941_v54  ;;  %v588_v43 = vrot.slane %v5642_v2, 4  ;;  %v870_v44 = vrot.slane %v5648_v29, 4  ;;  %v4672_v23 = vld [vmem:[%s6428_s3 + $0x524] ss:$16 sps:$4 sm:$0xff]  }
  0xa2   : > { %v5939_v13 = vcombine.high %v972_v58, %v972_v58  ;;  %v5941_v34 = vcombine.low %v972_v58, %v972_v58  ;;  %663 = vst [vmem:[#allocation2 + $0xa0] sm:$0x1] %v662_v7  ;;  %943 = vst [vmem:[#allocation2 + $0xa4] sm:$0x1] %v942_v32  ;;  %v4675_v36 = vld [vmem:[%s6428_s3 + $0x52c] ss:$16 sps:$4 sm:$0xff]   ;;  %v1230_v0 = vor.u32 %v1229_v24, %v1225_v39 }
  0xa3   : > { %2767 = vmatmul.mubr.bf16.gmra.mrb[12].mxu0 %v1187_v45  ;;  %3106 = vmatmul.mubr.bf16.gmra.mrb[12].mxu1 %v1187_v45  ;;  %v1263_v47 = vshll.u32 %v5662_v41, 16  ;;  %v4670_v18 = vld [vmem:[%s6428_s3 + $0x520] ss:$16 sps:$4 sm:$0xff]   ;;  %v4673_v61 = vld [vmem:[%s6428_s3 + $0x528] ss:$16 sps:$4 sm:$0xff]   ;;  %v1251_v49 = vshll.u32 %v5664_v42, 16 }
  0xa4   : > { %2830 = vmatpush1.bf16.msra.mxu0 %v4650_v25  ;;  %3169 = vmatpush1.bf16.msra.mxu1 %v4653_v50  ;;  %v1244_v59 = vshll.u32 %v5939_v13, 16  ;;  %v1232_v40 = vshll.u32 %v5941_v34, 16  ;;  %v4680_v63 = vld [vmem:[%s6428_s3 + $0x544] ss:$16 sps:$4 sm:$0xff]   ;;  %v1261_v5 = vshrl.u32 %v5662_v41, 16  ;;  %v1287_v56 = vshll.u32 %v5712_v21, 16 }
  0xa5   : > { %2831 = vmatprep.subr.bf16.mxu0 %v4658_v60  ;;  %3170 = vmatprep.subr.bf16.mxu1 %v4661_v3  ;;  %v668_v25 = vld [vmem:[#allocation2 + $0xb8] sm:$0x1]  ;;  %v948_v50 = vld [vmem:[#allocation2 + $0xbc] sm:$0x1]  ;;  %v1265_v27 = vrot.slane %v1263_v47, 1  ;;  %v1249_v52 = vshrl.u32 %v5664_v42, 16 }
  0xa6   : > { %2776 = vmatprep.mubr.bf16.mxu0 %v1223_v62  ;;  %3115 = vmatprep.mubr.bf16.mxu1 %v1223_v62  ;;  %v1246_v2 = vrot.slane %v1244_v59, 1  ;;  %v669_v29 = vsel %vm5210_vm4, %v588_v43, %v668_v25  ;;  %v1234_v45 = vrot.slane %v1232_v40, 1  ;;  %v949_v12 = vsel %vm5210_vm4, %v870_v44, %v948_v50  ;;  %v4683_v3 = vld [vmem:[%s6428_s3 + $0x54c] ss:$16 sps:$4 sm:$0xff]   ;;  %v4678_v17 = vld [vmem:[%s6428_s3 + $0x540] ss:$16 sps:$4 sm:$0xff]  }
  0xa7   : > { %670 = vst [vmem:[#allocation2 + $0xb8] sm:$0x1] %v669_v29  ;;  %950 = vst [vmem:[#allocation2 + $0xbc] sm:$0x1] %v949_v12  ;;  %v4681_v41 = vld [vmem:[%s6428_s3 + $0x548] ss:$16 sps:$4 sm:$0xff]   ;;  %v1266_v6 = vor.u32 %v1265_v27, %v1261_v5 }
  0xa8   : > { %2832 = vmatpush1.bf16.msra.mxu0 %v4656_v51  ;;  %3171 = vmatpush1.bf16.msra.mxu1 %v4659_v8  ;;  %v1247_v60 = vsel %vm1103_vm0, %v1242_v37, %v1246_v2  ;;  %v1235_v15 = vsel %vm1103_vm0, %v1230_v0, %v1234_v45  ;;  %v4686_v20 = vld [vmem:[%s6428_s3 + $0x564] ss:$16 sps:$4 sm:$0xff]   ;;  %v4689_v28 = vld [vmem:[%s6428_s3 + $0x56c] ss:$16 sps:$4 sm:$0xff]   ;;  %v4684_v42 = vld [vmem:[%s6428_s3 + $0x560] ss:$16 sps:$4 sm:$0xff]  }
  0xa9   : > { %2833 = vmatprep.subr.bf16.mxu0 %v4666_v46  ;;  %3172 = vmatprep.subr.bf16.mxu1 %v4669_v14  ;;  %v973_v51 = vld [vmem:[#allocation2 + $0xa0] sm:$0x11]  ;;  %v1253_v46 = vrot.slane %v1251_v49, 1  ;;  %v1285_v35 = vshrl.u32 %v5712_v21, 16  ;;  %v1289_v54 = vrot.slane %v1287_v56, 1 }
  0xaa   : > { %v5985_v8 = vcombine.high %v973_v51, %v973_v51  ;;  %v5987_v48 = vcombine.low %v973_v51, %v973_v51  ;;  %v4687_v14 = vld [vmem:[%s6428_s3 + $0x568] ss:$16 sps:$4 sm:$0xff]   ;;  %v4694_v21 = vld [vmem:[%s6428_s3 + $0x584] ss:$16 sps:$4 sm:$0xff]   ;;  %v4697_v59 = vld [vmem:[%s6428_s3 + $0x58c] ss:$16 sps:$4 sm:$0xff]  }
  0xab   : > { %2777 = vmatmul.mubr.bf16.gmra.mrb[16].mxu0 %v1211_v26  ;;  %3116 = vmatmul.mubr.bf16.gmra.mrb[16].mxu1 %v1211_v26  ;;  %v1254_v7 = vor.u32 %v1253_v46, %v1249_v52  ;;  %v4692_v26 = vld [vmem:[%s6428_s3 + $0x580] ss:$16 sps:$4 sm:$0xff]   ;;  %v4695_v24 = vld [vmem:[%s6428_s3 + $0x588] ss:$16 sps:$4 sm:$0xff]   ;;  %v1290_v40 = vor.u32 %v1289_v54, %v1285_v35  ;;  %v4703_v29 = vld [vmem:[%s6428_s3 + $0x5ac] ss:$16 sps:$4 sm:$0xff]  }
  0xac   : > { %2834 = vmatpush1.bf16.msra.mxu0 %v4664_v31  ;;  %3173 = vmatpush1.bf16.msra.mxu1 %v4667_v33  ;;  %v1268_v62 = vshll.u32 %v5985_v8, 16  ;;  %v1256_v10 = vshll.u32 %v5987_v48, 16  ;;  %v1275_v33 = vshll.u32 %v5715_v22, 16  ;;  %v975_v25 = vld [vmem:[#allocation2] sm:$0xee] }
  0xad   : > { %2835 = vmatprep.subr.bf16.mxu0 %v4672_v23  ;;  %3174 = vmatprep.subr.bf16.mxu1 %v4675_v36  ;;  %v1273_v23 = vshrl.u32 %v5715_v22, 16  ;;  %v982_v50 = vld [vmem:[#allocation2 + $0xa8] sm:$0xee]  ;;  %v4698_v49 = vld [vmem:[%s6428_s3 + $0x5a0] ss:$16 sps:$4 sm:$0xff]  }
  0xae   : > { %2786 = vmatprep.mubr.bf16.mxu0 %v1247_v60  ;;  %3125 = vmatprep.mubr.bf16.mxu1 %v1247_v60  ;;  %v1270_v58 = vrot.slane %v1268_v62, 1  ;;  %v1258_v31 = vrot.slane %v1256_v10, 1  ;;  %v974_v32 = vld [vmem:[#allocation2 + $0xb8] sm:$0x11]  ;;  %v1277_v2 = vrot.slane %v1275_v33, 1  ;;  %v3918_v45 = vcombine.high %v982_v50, %v5702_v9  ;;  %v4991_v35 = vld [vmem:[#allocation2 + $0x20] sm:$0xff] }
  0xaf   : > { %v3902_v39 = vcombine.high %v974_v32, %v974_v32  ;;  %v3901_v43 = vcombine.low %v974_v32, %v974_v32  ;;  %v4700_v60 = vld [vmem:[%s6428_s3 + $0x5a4] ss:$16 sps:$4 sm:$0xff]   ;;  %v4701_v12 = vld [vmem:[%s6428_s3 + $0x5a8] ss:$16 sps:$4 sm:$0xff]   ;;  %v3917_v27 = vcombine.low %v982_v50, %v5702_v9  ;;  %v4711_v56 = vld [vmem:[%s6428_s3 + $0x5cc] ss:$16 sps:$4 sm:$0xff]  }
  0xb0   : > { %2836 = vmatpush1.bf16.msra.mxu0 %v4670_v18  ;;  %3175 = vmatpush1.bf16.msra.mxu1 %v4673_v61  ;;  %v1271_v37 = vsel %vm1103_vm0, %v1266_v6, %v1270_v58  ;;  %v1259_v36 = vsel %vm1103_vm0, %v1254_v7, %v1258_v31  ;;  %v4990_v61 = vld [vmem:[#allocation2 + $0x8] sm:$0xff]  ;;  %v4708_v51 = vld [vmem:[%s6428_s3 + $0x5c4] ss:$16 sps:$4 sm:$0xff]   ;;  %v1357_v9 = vrot.slane %v5752_v57, 1  ;;  %v4706_v6 = vld [vmem:[%s6428_s3 + $0x5c0] ss:$16 sps:$4 sm:$0xff]  }
  0xb1   : > { %2837 = vmatprep.subr.bf16.mxu0 %v4680_v63  ;;  %3176 = vmatprep.subr.bf16.mxu1 %v4683_v3  ;;  %v1292_v44 = vshll.u32 %v3902_v39, 16  ;;  %v1280_v47 = vshll.u32 %v3901_v43, 16  ;;  %v3904_v0 = vcombine.high %v975_v25, %v4990_v61  ;;  %v1278_v63 = vor.u32 %v1277_v2, %v1273_v23  ;;  %v4709_v62 = vld [vmem:[%s6428_s3 + $0x5c8] ss:$16 sps:$4 sm:$0xff]   ;;  %v4714_v57 = vld [vmem:[%s6428_s3 + $0x5e4] ss:$16 sps:$4 sm:$0xff]  }
  0xb2   : > { %v1399_v5 = vrot.slane %v3902_v39, 1  ;;  %v1395_v52 = vrot.slane %v3917_v27, 1  ;;  %v3903_v10 = vcombine.low %v975_v25, %v4990_v61  ;;  %v4717_v58 = vld [vmem:[%s6428_s3 + $0x5ec] ss:$16 sps:$4 sm:$0xff]   ;;  %v4712_v7 = vld [vmem:[%s6428_s3 + $0x5e0] ss:$16 sps:$4 sm:$0xff]  }
  0xb3   : > { %2787 = vmatmul.mubr.bf16.gmra.mrb[20].mxu0 %v1235_v15  ;;  %3126 = vmatmul.mubr.bf16.gmra.mrb[20].mxu1 %v1235_v15  ;;  %v1294_v18 = vrot.slane %v1292_v44, 1  ;;  %v1282_v3 = vrot.slane %v1280_v47, 1  ;;  %v1398_v15 = vrot.slane %v3918_v45, 1  ;;  %v1356_v46 = vrot.slane %v3904_v0, 1  ;;  %v4715_v31 = vld [vmem:[%s6428_s3 + $0x5e8] ss:$16 sps:$4 sm:$0xff]  }
  0xb4   : > { %2838 = vmatpush1.bf16.msra.mxu0 %v4678_v17  ;;  %3177 = vmatpush1.bf16.msra.mxu1 %v4681_v41  ;;  %v1396_v17 = vrot.slane %v3901_v43, 1  ;;  %v976_v41 = vld [vmem:[#allocation2 + $0x18] sm:$0xee]  ;;  %v1353_v32 = vrot.slane %v3903_v10, 1  ;;  %v1354_v33 = vrot.slane %v5750_v16, 1  ;;  %v1360_v44 = vrot.slane %v5783_v38, 1 }
  0xb5   : > { %2839 = vmatprep.subr.bf16.mxu0 %v4686_v20  ;;  %3178 = vmatprep.subr.bf16.mxu1 %v4689_v28  ;;  %v1295_v22 = vsel %vm1103_vm0, %v1290_v40, %v1294_v18  ;;  %v6052_v20 = vsel %vm1352_vm1, %v1398_v15, %v1399_v5  ;;  %v1283_v28 = vsel %vm1103_vm0, %v1278_v63, %v1282_v3  ;;  %v1369_v23 = vrot.slane %v5825_v11, 1  ;;  %v4993_v50 = vld [vmem:[#allocation2 + $0x50] sm:$0xff]  ;;  %v979_v61 = vld [vmem:[#allocation2 + $0x60] sm:$0xee]  ;;  %v980_v27 = vld [vmem:[#allocation2 + $0x78] sm:$0xee] }
  0xb6   : > { %2796 = vmatprep.mubr.bf16.mxu0 %v1271_v37  ;;  %3135 = vmatprep.mubr.bf16.mxu1 %v1271_v37  ;;  %v3906_v54 = vcombine.high %v976_v41, %v4991_v35  ;;  %v1355_v39 = vsel %vm1352_vm1, %v1353_v32, %v1354_v33  ;;  %v3905_v43 = vcombine.low %v976_v41, %v4991_v35  ;;  %v1366_v18 = vrot.slane %v5827_v30, 1  ;;  %v4995_v15 = vld [vmem:[#allocation2 + $0x80] sm:$0xff] }
  0xb7   : > { %v1375_v38 = vrot.slane %v5859_v4, 1  ;;  %v1372_v3 = vrot.slane %v5861_v19, 1  ;;  %v1381_v30 = vrot.slane %v5905_v53, 1  ;;  %v1387_v19 = vrot.slane %v5939_v13, 1 }
  0xb8   : > { %2840 = vmatpush1.bf16.msra.mxu0 %v4684_v42  ;;  %3179 = vmatpush1.bf16.msra.mxu1 %v4687_v14  ;;  %v6062_v42 = vsel %vm1352_vm1, %v1395_v52, %v1396_v17  ;;  %v1358_v14 = vsel %vm1352_vm1, %v1356_v46, %v1357_v9  ;;  %v1362_v37 = vrot.slane %v3906_v54, 1  ;;  %v1359_v16 = vrot.slane %v3905_v43, 1  ;;  %v981_v9 = vld [vmem:[#allocation2 + $0x90] sm:$0xee] }
  0xb9   : > { %2841 = vmatprep.subr.bf16.mxu0 %v4694_v21  ;;  %3180 = vmatprep.subr.bf16.mxu1 %v4697_v59  ;;  %v1363_v21 = vrot.slane %v5781_v1, 1  ;;  %v977_v59 = vld [vmem:[#allocation2 + $0x30] sm:$0xee]  ;;  %v3914_v17 = vcombine.high %v980_v27, %v4995_v15  ;;  %v1378_v52 = vrot.slane %v5907_v55, 1  ;;  %v1393_v55 = vrot.slane %v5985_v8, 1 }
  0xba   : > { %v1361_v2 = vsel %vm1352_vm1, %v1359_v16, %v1360_v44 }
  0xbb   : > { %2797 = vmatmul.mubr.bf16.gmra.mrb[24].mxu0 %v1259_v36  ;;  %3136 = vmatmul.mubr.bf16.gmra.mrb[24].mxu1 %v1259_v36  ;;  %v978_v36 = vld [vmem:[#allocation2 + $0x48] sm:$0xee]  ;;  %v1386_v46 = vrot.slane %v3914_v17, 1 }
  0xbc   : > { %2842 = vmatpush1.bf16.msra.mxu0 %v4692_v26  ;;  %3181 = vmatpush1.bf16.msra.mxu1 %v4695_v24  ;;  %v1364_v26 = vsel %vm1352_vm1, %v1362_v37, %v1363_v21  ;;  %v4992_v24 = vld [vmem:[#allocation2 + $0x38] sm:$0xff]  ;;  %v3909_v0 = vcombine.low %v978_v36, %v4993_v50  ;;  %v1609_v37 = vld [vmem:[%s6429_s4] sm:$0xf] }
  0xbd   : > { %2843 = vmatprep.subr.bf16.mxu0 %v4700_v60  ;;  %3182 = vmatprep.subr.bf16.mxu1 %v4703_v29  ;;  %v3908_v40 = vcombine.high %v977_v59, %v4992_v24  ;;  %v3907_v47 = vcombine.low %v977_v59, %v4992_v24  ;;  %v3910_v60 = vcombine.high %v978_v36, %v4993_v50 }
  0xbe   : > { %2806 = vmatprep.mubr.bf16.mxu0 %v1295_v22  ;;  %3145 = vmatprep.mubr.bf16.mxu1 %v1295_v22  ;;  %v1371_v63 = vrot.slane %v3909_v0, 1 }
  0xbf   : > { %v1368_v1 = vrot.slane %v3908_v40, 1  ;;  %v1365_v29 = vrot.slane %v3907_v47, 1  ;;  %v1374_v22 = vrot.slane %v3910_v60, 1 }
  0xc0   : > { %2844 = vmatpush1.bf16.msra.mxu0 %v4698_v49  ;;  %3183 = vmatpush1.bf16.msra.mxu1 %v4701_v12  ;;  %v4994_v49 = vld [vmem:[#allocation2 + $0x68] sm:$0xff]  ;;  %v1373_v4 = vsel %vm1352_vm1, %v1371_v63, %v1372_v3 }
  0xc1   : > { %2845 = vmatprep.subr.bf16.mxu0 %v4708_v51  ;;  %3184 = vmatprep.subr.bf16.mxu1 %v4711_v56  ;;  %v1370_v25 = vsel %vm1352_vm1, %v1368_v1, %v1369_v23  ;;  %v1367_v11 = vsel %vm1352_vm1, %v1365_v29, %v1366_v18  ;;  %v1376_v45 = vsel %vm1352_vm1, %v1374_v22, %v1375_v38 }
  0xc2   : > { %v3912_v12 = vcombine.high %v979_v61, %v4994_v49  ;;  %v3911_v51 = vcombine.low %v979_v61, %v4994_v49 }
  0xc3   : > { %2807 = vmatmul.mubr.bf16.gmra.mrb[28].mxu0 %v1283_v28  ;;  %3146 = vmatmul.mubr.bf16.gmra.mrb[28].mxu1 %v1283_v28  ;;  %v3913_v28 = vcombine.low %v980_v27, %v4995_v15 }
  0xc4   : > { %2846 = vmatpush1.bf16.msra.mxu0 %v4706_v6  ;;  %3185 = vmatpush1.bf16.msra.mxu1 %v4709_v62  ;;  %v1380_v5 = vrot.slane %v3912_v12, 1  ;;  %v1377_v41 = vrot.slane %v3911_v51, 1  ;;  %v1388_v6 = vsel %vm1352_vm1, %v1386_v46, %v1387_v19  ;;  %v4996_v62 = vld [vmem:[#allocation2 + $0x98] sm:$0xff] }
  0xc5   : > { %2847 = vmatprep.subr.bf16.mxu0 %v4714_v57  ;;  %3186 = vmatprep.subr.bf16.mxu1 %v4717_v58  ;;  %v3916_v10 = vcombine.high %v981_v9, %v4996_v62  ;;  %v1383_v57 = vrot.slane %v3913_v28, 1  ;;  %v1384_v58 = vrot.slane %v5941_v34, 1  ;;  %v3915_v54 = vcombine.low %v981_v9, %v4996_v62 }
  0xc6   : > { %2849 = vmatprep.mubr.bf16.mxu0 %v1358_v14  ;;  %3188 = vmatprep.mubr.bf16.mxu1 %v1358_v14  ;;  %v1382_v56 = vsel %vm1352_vm1, %v1380_v5, %v1381_v30  ;;  %v1379_v53 = vsel %vm1352_vm1, %v1377_v41, %v1378_v52  ;;  %v1611_v34 = vlaneseq }
  0xc7   : > { %v1392_v35 = vrot.slane %v3916_v10, 1  ;;  %v1385_v13 = vsel %vm1352_vm1, %v1383_v57, %v1384_v58 }
  0xc8   : > { %2848 = vmatpush1.bf16.msra.mxu0 %v4712_v7  ;;  %3187 = vmatpush1.bf16.msra.mxu1 %v4715_v31  ;;  %v1389_v7 = vrot.slane %v3915_v54, 1  ;;  %v1390_v31 = vrot.slane %v5987_v48, 1  ;;  %v1612_v8 = vshrl.u32 %v1611_v34, 7 }
  0xc9   : > { %v1394_v14 = vsel %vm1352_vm1, %v1392_v35, %v1393_v55 }
  0xca   : > { %v1391_v32 = vsel %vm1352_vm1, %v1389_v7, %v1390_v31  ;;  %v1613_v33 = vsub.s32 0, %v1612_v8  ;;  %v1617_v48 = vsub.s32 1, %v1612_v8  ;;  %v1625_v21 = vsub.s32 3, %v1612_v8 }
  0xcb   : > { %2850 = vmatmul.mubr.bf16.vlgmr.msra.gmra.mrb[0].mxu0 %v1355_v39  ;;  %3189 = vmatmul.mubr.bf16.vlgmr.msra.gmra.mrb[0].mxu1 %v1355_v39 }
  0xcc   : > { %2859 = vmatprep.mubr.bf16.mxu0 %v1364_v26  ;;  %3198 = vmatprep.mubr.bf16.mxu1 %v1364_v26  ;;  %v6110_v59 = vrot.slane %v1609_v37, %v1613_v33  ;;  %v6112_v39 = vrot.slane %v1609_v37, %v1617_v48  ;;  %v6114_v43 = vrot.slane %v1609_v37, %v1625_v21 }
  0xd3   : > { %2860 = vmatmul.mubr.bf16.gmra.mrb[4].mxu0 %v1361_v2  ;;  %3199 = vmatmul.mubr.bf16.gmra.mrb[4].mxu1 %v1361_v2 }
  0xd4   : > { %2869 = vmatprep.mubr.bf16.mxu0 %v1370_v25  ;;  %3208 = vmatprep.mubr.bf16.mxu1 %v1370_v25 }
  0xdb   : > { %2870 = vmatmul.mubr.bf16.gmra.mrb[8].mxu0 %v1367_v11  ;;  %3209 = vmatmul.mubr.bf16.gmra.mrb[8].mxu1 %v1367_v11 }
  0xdc   : > { %2879 = vmatprep.mubr.bf16.mxu0 %v1376_v45  ;;  %3218 = vmatprep.mubr.bf16.mxu1 %v1376_v45 }
  0xe3   : > { %2880 = vmatmul.mubr.bf16.gmra.mrb[12].mxu0 %v1373_v4  ;;  %3219 = vmatmul.mubr.bf16.gmra.mrb[12].mxu1 %v1373_v4 }
  0xe4   : > { %2889 = vmatprep.mubr.bf16.mxu0 %v1382_v56  ;;  %3228 = vmatprep.mubr.bf16.mxu1 %v1382_v56 }
  0xeb   : > { %2890 = vmatmul.mubr.bf16.gmra.mrb[16].mxu0 %v1379_v53  ;;  %3229 = vmatmul.mubr.bf16.gmra.mrb[16].mxu1 %v1379_v53 }
  0xec   : > { %2899 = vmatprep.mubr.bf16.mxu0 %v1388_v6  ;;  %3238 = vmatprep.mubr.bf16.mxu1 %v1388_v6 }
  0xf3   : > { %2900 = vmatmul.mubr.bf16.gmra.mrb[20].mxu0 %v1385_v13  ;;  %3239 = vmatmul.mubr.bf16.gmra.mrb[20].mxu1 %v1385_v13 }
  0xf4   : > { %2909 = vmatprep.mubr.bf16.mxu0 %v1394_v14  ;;  %3248 = vmatprep.mubr.bf16.mxu1 %v1394_v14 }
  0xfb   : > { %2910 = vmatmul.mubr.bf16.gmra.mrb[24].mxu0 %v1391_v32  ;;  %3249 = vmatmul.mubr.bf16.gmra.mrb[24].mxu1 %v1391_v32 }
  0xfc   : > { %2919 = vmatprep.mubr.bf16.mxu0 %v6052_v20  ;;  %3258 = vmatprep.mubr.bf16.mxu1 %v6052_v20  ;;  %v1621_v20 = vsub.s32 2, %v1612_v8 }
  0xfe   : > { %v6119_v47 = vrot.slane %v1609_v37, %v1621_v20 }
 0x103   : > { %2920 = vmatmul.mubr.bf16.gmra.mrb[28].mxu0 %v6062_v42  ;;  %3259 = vmatmul.mubr.bf16.gmra.mrb[28].mxu1 %v6062_v42 }
 0x19e   : > { %v2851_v26 = vpop.f32.mrb[0].mxu0  ;;  %v3190_v24 = vpop.f32.mrb[0].mxu1 }
 0x19f   : > { %v4198_v42 = vadd.f32 %v2851_v26, %v6110_v59  ;;  %v2853_v40 = vpop.f32.mrb[1].mxu0  ;;  %v3192_v16 = vpop.f32.mrb[1].mxu1  ;;  %v4230_v0 = vadd.f32 %v3190_v24, %v6119_v47 }
 0x1a0   : > { %v4199_v44 = vadd.f32 %v2853_v40, %v6112_v39  ;;  %v4231_v1 = vadd.f32 %v3192_v16, %v6114_v43  ;;  %v2855_v23 = vpop.f32.mrb[2].mxu0  ;;  %v3194_v36 = vpop.f32.mrb[2].mxu1 }
 0x1a1   : > { %v4111_v2 = vmul.f32 -1.442695, %v4198_v42  ;;  %v4200_v25 = vadd.f32 %v2855_v23, %v6110_v59  ;;  %v2857_v50 = vpop.f32.mrb[3].mxu0  ;;  %v3196_v60 = vpop.f32.mrb[3].mxu1  ;;  %v4232_v19 = vadd.f32 %v3194_v36, %v6119_v47 }
 0x1a2   : > { %v4127_v29 = vmul.f32 -1.442695, %v4199_v44  ;;  %v4143_v18 = vmul.f32 -1.442695, %v4231_v1  ;;  %v4201_v22 = vadd.f32 %v2857_v50, %v6112_v39  ;;  %v4233_v38 = vadd.f32 %v3196_v60, %v6114_v43 }
 0x1a3   : > { %4734 = vpow2.f32 %v4111_v2  ;;  %v4112_v61 = vmul.f32 -1.442695, %v4200_v25 }
 0x1a4   : > { %4736 = vpow2.f32 %v4127_v29  ;;  %v4128_v11 = vmul.f32 -1.442695, %v4201_v22  ;;  %v4144_v45 = vmul.f32 -1.442695, %v4233_v38 }
 0x1a5   : > { %4738 = vpow2.f32 %v4143_v18 }
 0x1a6   : > { %4740 = vpow2.f32 %v4112_v61  ;;  %v2861_v49 = vpop.f32.mrb[4].mxu0  ;;  %v3200_v12 = vpop.f32.mrb[4].mxu1 }
 0x1a7   : > { %v4202_v63 = vadd.f32 %v2861_v49, %v6110_v59  ;;  %v2863_v3 = vpop.f32.mrb[5].mxu0  ;;  %v3202_v5 = vpop.f32.mrb[5].mxu1  ;;  %4742 = vpow2.f32 %v4128_v11  ;;  %v4234_v10 = vadd.f32 %v3200_v12, %v6119_v47 }
 0x1a8   : > { %v4203_v30 = vadd.f32 %v2863_v3, %v6112_v39  ;;  %v4235_v27 = vadd.f32 %v3202_v5, %v6114_v43  ;;  %v2865_v4 = vpop.f32.mrb[6].mxu0  ;;  %v3204_v51 = vpop.f32.mrb[6].mxu1  ;;  %4744 = vtanh.f32 %v4230_v0 }
 0x1a9   : > { %v4113_v56 = vmul.f32 -1.442695, %v4202_v63  ;;  %v4204_v15 = vadd.f32 %v2865_v4, %v6110_v59  ;;  %v2867_v17 = vpop.f32.mrb[7].mxu0  ;;  %v3206_v41 = vpop.f32.mrb[7].mxu1  ;;  %4746 = vpow2.f32 %v4144_v45  ;;  %v4236_v48 = vadd.f32 %v3204_v51, %v6119_v47  ;;  %v3573_v45 = vld [vmem:[%s6149_s9] sm:$0xff] }
 0x1aa   : > { %v4129_v52 = vmul.f32 -1.442695, %v4203_v30  ;;  %v4145_v46 = vmul.f32 -1.442695, %v4235_v27  ;;  %v4205_v53 = vadd.f32 %v2867_v17, %v6112_v39  ;;  %v4237_v21 = vadd.f32 %v3206_v41, %v6114_v43  ;;  %v6173_v41 = vld [vmem:[%s6149_s9 + $0x18] sm:$0xff] }
 0x1ab   : > { %4748 = vpow2.f32 %v4113_v56  ;;  %v4114_v9 = vmul.f32 -1.442695, %v4204_v15  ;;  %v3574_v56 = vld [vmem:[%s6149_s9 + $0x8] sm:$0xff]  ;;  %v3575_v15 = vld [vmem:[%s6149_s9 + $0x10] sm:$0xff] }
 0x1ac   : > { %4750 = vpow2.f32 %v4129_v52  ;;  %v4130_v7 = vmul.f32 -1.442695, %v4205_v53  ;;  %v4146_v23 = vmul.f32 -1.442695, %v4237_v21  ;;  %v6176_v52 = vld [vmem:[%s6149_s9 + $0x20] sm:$0xff] }
 0x1ad   : > { %v4735_v28 = vpop.eup %4734  ;;  %4752 = vpow2.f32 %v4145_v46  ;;  %v6179_v46 = vld [vmem:[%s6149_s9 + $0x28] sm:$0xff]  ;;  %v6188_v53 = vld [vmem:[%s6149_s9 + $0x40] sm:$0xff] }
 0x1ae   : > { %v4737_v6 = vpop.eup %4736  ;;  %v3317_v62 = vadd.f32 1.0, %v4735_v28  ;;  %4754 = vpow2.f32 %v4114_v9  ;;  %v2871_v57 = vpop.f32.mrb[8].mxu0  ;;  %v6185_v9 = vld [vmem:[%s6149_s9 + $0x38] sm:$0xff]  ;;  %v6191_v28 = vld [vmem:[%s6149_s9 + $0x48] sm:$0xff] }
 0x1af   : > { %v6132_v58 = vpop.f32.mrb[8].mxu1  ;;  %v4739_v35 = vpop.eup %4738  ;;  %v3413_v55 = vadd.f32 1.0, %v4737_v6  ;;  %4756 = vtanh.f32 %v4232_v19  ;;  %v4206_v40 = vadd.f32 %v2871_v57, %v6110_v59  ;;  %v6182_v19 = vld [vmem:[%s6149_s9 + $0x30] sm:$0xff]  ;;  %v6197_v57 = vld [vmem:[%s6149_s9 + $0x58] sm:$0xff] }
 0x1b0   : > { %v2873_v13 = vpop.f32.mrb[9].mxu0  ;;  %v6134_v54 = vpop.f32.mrb[9].mxu1  ;;  %4758 = vrcp.f32 %v3317_v62  ;;  %v3525_v26 = vadd.f32 1.0, %v4739_v35  ;;  %v6200_v35 = vld [vmem:[%s6149_s9 + $0x60] sm:$0xff] }
 0x1b1   : > { %v4741_v14 = vpop.eup %4740  ;;  %v2875_v31 = vpop.f32.mrb[10].mxu0  ;;  %4760 = vrcp.f32 %v3413_v55  ;;  %v4207_v36 = vadd.f32 %v2873_v13, %v6112_v39  ;;  %v4115_v38 = vmul.f32 -1.442695, %v4206_v40  ;;  %v4239_v13 = vadd.f32 %v6134_v54, %v6114_v43 }
 0x1b2   : > { %v6136_v32 = vpop.f32.mrb[10].mxu1  ;;  %v3318_v34 = vadd.f32 1.0, %v4741_v14  ;;  %v6138_v8 = vpop.f32.mrb[11].mxu0  ;;  %4762 = vtanh.f32 %v4234_v10  ;;  %v4208_v63 = vadd.f32 %v2875_v31, %v6110_v59  ;;  %v6194_v10 = vld [vmem:[%s6149_s9 + $0x50] sm:$0xff]  ;;  %v4238_v40 = vadd.f32 %v6132_v58, %v6119_v47 }
 0x1b3   : > { %v6140_v33 = vpop.f32.mrb[11].mxu1  ;;  %v4743_v37 = vpop.eup %4742  ;;  %v4131_v27 = vmul.f32 -1.442695, %v4207_v36  ;;  %v6214_v31 = vld [vmem:[%s6149_s9 + $0x70] sm:$0xff] }
 0x1b4   : > { %v4745_v20 = vpop.eup %4744  ;;  %4764 = vrcp.f32 %v3318_v34  ;;  %v3414_v24 = vadd.f32 1.0, %v4743_v37  ;;  %v4116_v14 = vmul.f32 -1.442695, %v4208_v63  ;;  %v6217_v34 = vld [vmem:[%s6149_s9 + $0x78] sm:$0xff] }
 0x1b5   : > { %v4747_v42 = vpop.eup %4746  ;;  %4766 = vpow2.f32 %v4130_v7  ;;  %v6211_v7 = vld [vmem:[%s6149_s9 + $0x68] sm:$0xff] }
 0x1b6   : > { %v4749_v16 = vpop.eup %4748  ;;  %4768 = vrcp.f32 %v3414_v24  ;;  %v6152_v2 = vpop.f32.mrb[12].mxu0  ;;  %v3526_v49 = vadd.f32 1.0, %v4747_v42 }
 0x1b7   : > { %v4751_v44 = vpop.eup %4750  ;;  %v3319_v1 = vadd.f32 1.0, %v4749_v16  ;;  %4770 = vtanh.f32 %v4236_v48  ;;  %v6154_v25 = vpop.f32.mrb[12].mxu1  ;;  %v4210_v63 = vadd.f32 %v6152_v2, %v6110_v59  ;;  %v4241_v2 = vadd.f32 %v6140_v33, %v6114_v43 }
 0x1b8   : > { %v4753_v50 = vpop.eup %4752  ;;  %4772 = vrcp.f32 %v3525_v26  ;;  %v3415_v60 = vadd.f32 1.0, %v4751_v44  ;;  %v6156_v29 = vpop.f32.mrb[13].mxu0 }
 0x1b9   : > { %v6158_v18 = vpop.f32.mrb[13].mxu1  ;;  %v4755_v22 = vpop.eup %4754  ;;  %4774 = vrcp.f32 %v3319_v1  ;;  %v3527_v17 = vadd.f32 1.0, %v4753_v50 }
 0x1ba   : > { %v6160_v61 = vpop.f32.mrb[14].mxu0  ;;  %v6162_v11 = vpop.f32.mrb[14].mxu1  ;;  %4776 = vrcp.f32 %v3415_v60  ;;  %v3320_v12 = vadd.f32 1.0, %v4755_v22  ;;  %v4147_v60 = vmul.f32 -1.442695, %v4239_v13 }
 0x1bb   : > { %v4757_v0 = vpop.eup %4756  ;;  %v6166_v3 = vpop.f32.mrb[15].mxu0  ;;  %4778 = vpow2.f32 %v4146_v23 }
 0x1bc   : > { %v6168_v5 = vpop.f32.mrb[15].mxu1  ;;  %v4759_v30 = vpop.eup %4758  ;;  %4780 = vrcp.f32 %v3320_v12 }
 0x1bd   : > { %v4761_v4 = vpop.eup %4760  ;;  %v3605_v51 = vmul.f32 %v4759_v30, %v4745_v20  ;;  %4782 = vpow2.f32 %v4115_v38  ;;  %v4209_v20 = vadd.f32 %v6138_v8, %v6112_v39 }
 0x1be   : > { %v4763_v6 = vpop.eup %4762  ;;  %v3589_v62 = vmul.f32 %v4761_v4, %v3573_v45  ;;  %4784 = vrcp.f32 %v3526_v49  ;;  %v6221_v26 = vpop.f32.mrb[16].mxu0  ;;  %v4240_v4 = vadd.f32 %v6136_v32, %v6119_v47 }
 0x1bf   : > { %v4765_v55 = vpop.eup %4764  ;;  %4786 = vpow2.f32 %v4131_v27  ;;  %v6223_v24 = vpop.f32.mrb[16].mxu1  ;;  %v4132_v12 = vmul.f32 -1.442695, %v4209_v20 }
 0x1c0   : > { %v4767_v37 = vpop.eup %4766  ;;  %v3621_v48 = vadd.f32 %v3605_v51, %v3589_v62  ;;  %v3606_v21 = vmul.f32 %v4765_v55, %v4757_v0  ;;  %4788 = vrcp.f32 %v3527_v17  ;;  %v6227_v16 = vpop.f32.mrb[17].mxu0 }
 0x1c1   : > { %v4769_v54 = vpop.eup %4768  ;;  %v3416_v42 = vadd.f32 1.0, %v4767_v37  ;;  %v6229_v44 = vpop.f32.mrb[17].mxu1 }
 0x1c2   : > { %v4771_v1 = vpop.eup %4770  ;;  %4790 = vtanh.f32 %v3621_v48  ;;  %v3590_v23 = vmul.f32 %v4769_v54, %v3574_v56  ;;  %v2895_v36 = vpop.f32.mrb[18].mxu0  ;;  %3669 = vst [vmem:[%s6206_s12] sm:$0xff] %v3621_v48 }
 0x1c3   : > { %v3234_v50 = vpop.f32.mrb[18].mxu1  ;;  %v4773_v8 = vpop.eup %4772  ;;  %4792 = vrcp.f32 %v3416_v42  ;;  %v6233_v22 = vadd.f32 %v2895_v36, %v6110_v59 }
 0x1c4   : > { %v6236_v38 = vadd.f32 %v3234_v50, %v6119_v47  ;;  %v2897_v58 = vpop.f32.mrb[19].mxu0  ;;  %v3236_v0 = vpop.f32.mrb[19].mxu1  ;;  %v3622_v49 = vadd.f32 %v3606_v21, %v3590_v23  ;;  %4794 = vpow2.f32 %v4116_v14 }
 0x1c5   : > { %v4775_v45 = vpop.eup %4774  ;;  %4796 = vtanh.f32 %v4238_v40  ;;  %v6243_v17 = vadd.f32 %v2897_v58, %v6112_v39  ;;  %v6246_v62 = vadd.f32 %v3236_v0, %v6114_v43 }
 0x1c6   : > { %v4777_v30 = vpop.eup %4776  ;;  %v3607_v27 = vmul.f32 %v4775_v45, %v4763_v6  ;;  %4798 = vtanh.f32 %v3622_v49  ;;  %3670 = vst [vmem:[%s6206_s12 + $0x8] sm:$0xff] %v3622_v49  ;;  %v4211_v6 = vadd.f32 %v6156_v29, %v6112_v39  ;;  %v2901_v37 = vpop.f32.mrb[20].mxu0  ;;  %v4148_v45 = vmul.f32 -1.442695, %v4241_v2 }
 0x1c7   : > { %v4779_v51 = vpop.eup %4778  ;;  %v3591_v56 = vmul.f32 %v4777_v30, %v3575_v15  ;;  %4800 = vpow2.f32 %v4147_v60  ;;  %v4117_v15 = vmul.f32 -1.442695, %v4210_v63  ;;  %v3240_v48 = vpop.f32.mrb[20].mxu1  ;;  %v6254_v42 = vadd.f32 %v2901_v37, %v6110_v59 }
 0x1c8   : > { %v4781_v55 = vpop.eup %4780  ;;  %4802 = vpow2.f32 %v4132_v12  ;;  %v3528_v20 = vadd.f32 1.0, %v4779_v51  ;;  %v2903_v40 = vpop.f32.mrb[21].mxu0  ;;  %v6257_v29 = vadd.f32 %v3240_v48, %v6119_v47 }
 0x1c9   : > { %v4783_v13 = vpop.eup %4782  ;;  %v3623_v32 = vadd.f32 %v3607_v27, %v3591_v56  ;;  %v3608_v14 = vmul.f32 %v4781_v55, %v4771_v1  ;;  %4804 = vtanh.f32 %v4240_v4  ;;  %v3242_v33 = vpop.f32.mrb[21].mxu1  ;;  %v6260_v1 = vadd.f32 %v2903_v40, %v6112_v39 }
 0x1ca   : > { %v4785_v21 = vpop.eup %4784  ;;  %v3321_v54 = vadd.f32 1.0, %v4783_v13  ;;  %v6263_v36 = vadd.f32 %v3242_v33, %v6114_v43  ;;  %v2905_v50 = vpop.f32.mrb[22].mxu0  ;;  %v4133_v27 = vmul.f32 -1.442695, %v4211_v6  ;;  %v4212_v4 = vadd.f32 %v6160_v61, %v6110_v59 }
 0x1cb   : > { %v4787_v23 = vpop.eup %4786  ;;  %4806 = vtanh.f32 %v3623_v32  ;;  %v3244_v60 = vpop.f32.mrb[22].mxu1  ;;  %3671 = vst [vmem:[%s6206_s12 + $0x10] sm:$0xff] %v3623_v32  ;;  %v6267_v49 = vadd.f32 %v2905_v50, %v6110_v59  ;;  %v4243_v61 = vadd.f32 %v6158_v18, %v6114_v43 }
 0x1cc   : > { %v4789_v58 = vpop.eup %4788  ;;  %4808 = vrcp.f32 %v3321_v54  ;;  %v3417_v0 = vadd.f32 1.0, %v4787_v23  ;;  %v2907_v12 = vpop.f32.mrb[23].mxu0  ;;  %v6278_v55 = vadd.f32 %v3244_v60, %v6119_v47  ;;  %v4118_v54 = vmul.f32 -1.442695, %v4212_v4 }
 0x1cd   : > { %v3246_v63 = vpop.f32.mrb[23].mxu1  ;;  %v4791_v30 = vpop.eup %4790  ;;  %4810 = vpow2.f32 %v4117_v15  ;;  %v6282_v32 = vadd.f32 %v2907_v12, %v6112_v39  ;;  %v4149_v4 = vmul.f32 -1.442695, %v4243_v61 }
 0x1ce   : > { %v4793_v51 = vpop.eup %4792  ;;  %v3653_v56 = vmul.f32 %v4791_v30, %v4773_v8  ;;  %4812 = vrcp.f32 %v3417_v0  ;;  %v6285_v37 = vadd.f32 %v3246_v63, %v6114_v43  ;;  %v3250_v40 = vpop.f32.mrb[24].mxu1 }
 0x1cf   : > { %v4795_v2 = vpop.eup %4794  ;;  %v3592_v13 = vmul.f32 %v4793_v51, %v6173_v41  ;;  %4814 = vrcp.f32 %v3528_v20  ;;  %v4213_v41 = vadd.f32 %v6166_v3, %v6112_v39  ;;  %v2911_v20 = vpop.f32.mrb[24].mxu0  ;;  %v6296_v60 = vadd.f32 %v3250_v40, %v6119_v47 }
 0x1d0   : > { %v4797_v6 = vpop.eup %4796  ;;  %3685 = vst [vmem:[%s6273_s16] sm:$0xff] %v3653_v56  ;;  %v3322_v15 = vadd.f32 1.0, %v4795_v2  ;;  %4816 = vpow2.f32 %v4148_v45  ;;  %v6293_v50 = vadd.f32 %v2911_v20, %v6110_v59  ;;  %v2913_v18 = vpop.f32.mrb[25].mxu0  ;;  %v4242_v3 = vadd.f32 %v6154_v25, %v6119_v47 }
 0x1d1   : > { %v4799_v8 = vpop.eup %4798  ;;  %v3624_v48 = vadd.f32 %v3608_v14, %v3592_v13  ;;  %4818 = vpow2.f32 %v4133_v27  ;;  %v3252_v14 = vpop.f32.mrb[25].mxu1  ;;  %v6301_v45 = vadd.f32 %v2913_v18, %v6112_v39  ;;  %v4214_v51 = vadd.f32 %v6221_v26, %v6110_v59 }
 0x1d2   : > { %v4801_v33 = vpop.eup %4800  ;;  %v3654_v23 = vmul.f32 %v4799_v8, %v4785_v21  ;;  %4820 = vrcp.f32 %v3322_v15  ;;  %v6304_v12 = vadd.f32 %v3252_v14, %v6114_v43  ;;  %v2915_v21 = vpop.f32.mrb[26].mxu0  ;;  %v4134_v15 = vmul.f32 -1.442695, %v4213_v41 }
 0x1d3   : > { %v4803_v0 = vpop.eup %4802  ;;  %4822 = vtanh.f32 %v3624_v48  ;;  %v3254_v63 = vpop.f32.mrb[26].mxu1  ;;  %3672 = vst [vmem:[%s6206_s12 + $0x18] sm:$0xff] %v3624_v48  ;;  %v6311_v56 = vadd.f32 %v2915_v21, %v6110_v59  ;;  %v4245_v8 = vadd.f32 %v6168_v5, %v6114_v43  ;;  %v3529_v40 = vadd.f32 1.0, %v4801_v33 }
 0x1d4   : > { %v4805_v30 = vpop.eup %4804  ;;  %3686 = vst [vmem:[%s6273_s16 + $0x8] sm:$0xff] %v3654_v23  ;;  %v3418_v27 = vadd.f32 1.0, %v4803_v0  ;;  %v2917_v25 = vpop.f32.mrb[27].mxu0  ;;  %4824 = vpow2.f32 %v4118_v54  ;;  %v6316_v61 = vadd.f32 %v3254_v63, %v6119_v47  ;;  %v4119_v5 = vmul.f32 -1.442695, %v4214_v51 }
 0x1d5   : > { %v3256_v2 = vpop.f32.mrb[27].mxu1  ;;  %v4807_v13 = vpop.eup %4806  ;;  %v6319_v18 = vadd.f32 %v2917_v25, %v6112_v39  ;;  %v4150_v63 = vmul.f32 -1.442695, %v4245_v8 }
 0x1d6   : > { %v4809_v48 = vpop.eup %4808  ;;  %v3655_v20 = vmul.f32 %v4807_v13, %v4789_v58  ;;  %4826 = vrcp.f32 %v3418_v27  ;;  %v6322_v14 = vadd.f32 %v3256_v2, %v6114_v43  ;;  %v4215_v58 = vadd.f32 %v6227_v16, %v6112_v39 }
 0x1d7   : > { %v4811_v26 = vpop.eup %4810  ;;  %v3609_v23 = vmul.f32 %v4809_v48, %v4797_v6  ;;  %4828 = vtanh.f32 %v4242_v3  ;;  %v2921_v6 = vpop.f32.mrb[28].mxu0 }
 0x1d8   : > { %v4813_v54 = vpop.eup %4812  ;;  %3687 = vst [vmem:[%s6273_s16 + $0x10] sm:$0xff] %v3655_v20  ;;  %v3323_v41 = vadd.f32 1.0, %v4811_v26  ;;  %4830 = vpow2.f32 %v4149_v4  ;;  %v3260_v3 = vpop.f32.mrb[28].mxu1  ;;  %v6329_v27 = vadd.f32 %v2921_v6, %v6110_v59  ;;  %v4135_v26 = vmul.f32 -1.442695, %v4215_v58 }
 0x1d9   : > { %v4815_v33 = vpop.eup %4814  ;;  %v3593_v0 = vmul.f32 %v4813_v54, %v6176_v52  ;;  %4832 = vpow2.f32 %v4134_v15  ;;  %v6332_v25 = vadd.f32 %v3260_v3, %v6119_v47  ;;  %v2923_v4 = vpop.f32.mrb[29].mxu0 }
 0x1da   : > { %v4817_v21 = vpop.eup %4816  ;;  %4834 = vrcp.f32 %v3323_v41  ;;  %v3262_v51 = vpop.f32.mrb[29].mxu1  ;;  %v6335_v52 = vadd.f32 %v2923_v4, %v6112_v39  ;;  %v4247_v4 = vadd.f32 %v6229_v44, %v6114_v43 }
 0x1db   : > { %v4819_v2 = vpop.eup %4818  ;;  %v3625_v13 = vadd.f32 %v3609_v23, %v3593_v0  ;;  %4836 = vrcp.f32 %v3529_v40  ;;  %v6338_v16 = vadd.f32 %v3262_v51, %v6114_v43  ;;  %v2925_v15 = vpop.f32.mrb[30].mxu0  ;;  %v4244_v0 = vadd.f32 %v6162_v11, %v6119_v47 }
 0x1dc   : > { %v3264_v8 = vpop.f32.mrb[30].mxu1  ;;  %v4821_v48 = vpop.eup %4820  ;;  %v3419_v20 = vadd.f32 1.0, %v4819_v2  ;;  %4838 = vpow2.f32 %v4119_v5  ;;  %v6341_v54 = vadd.f32 %v2925_v15, %v6110_v59  ;;  %v3530_v58 = vadd.f32 1.0, %v4817_v21 }
 0x1dd   : > { %v2927_v41 = vpop.f32.mrb[31].mxu0  ;;  %v3266_v6 = vpop.f32.mrb[31].mxu1  ;;  %4840 = vtanh.f32 %v3625_v13  ;;  %v3610_v23 = vmul.f32 %v4821_v48, %v4805_v30  ;;  %3673 = vst [vmem:[%s6206_s12 + $0x20] sm:$0xff] %v3625_v13  ;;  %v6349_v5 = vadd.f32 %v3264_v8, %v6119_v47  ;;  %v4246_v48 = vadd.f32 %v6223_v24, %v6119_v47 }
 0x1de   : > { %v4823_v40 = vpop.eup %4822  ;;  %4842 = vrcp.f32 %v3419_v20  ;;  %v6352_v51 = vadd.f32 %v2927_v41, %v6112_v39  ;;  %v6355_v30 = vadd.f32 %v3266_v6, %v6114_v43  ;;  %v4151_v39 = vmul.f32 -1.442695, %v4247_v4 }
 0x1df   : > { %v3656_v3 = vmul.f32 %v4823_v40, %v4815_v33  ;;  %v4825_v59 = vpop.eup %4824  ;;  %4844 = vpow2.f32 %v4150_v63  ;;  %v4120_v33 = vmul.f32 -1.442695, %v6233_v22 }
 0x1e0   : > { %v4827_v2 = vpop.eup %4826  ;;  %v3324_v11 = vadd.f32 1.0, %v4825_v59  ;;  %4846 = vpow2.f32 %v4135_v26 }
 0x1e1   : > { %3688 = vst [vmem:[%s6273_s16 + $0x18] sm:$0xff] %v3656_v3  ;;  %v4829_v13 = vpop.eup %4828  ;;  %v3594_v44 = vmul.f32 %v4827_v2, %v6179_v46  ;;  %4848 = vtanh.f32 %v4244_v0  ;;  %v4136_v46 = vmul.f32 -1.442695, %v6243_v17  ;;  %v4121_v3 = vmul.f32 -1.442695, %v6254_v42 }
 0x1e2   : > { %v4831_v15 = vpop.eup %4830  ;;  %4850 = vrcp.f32 %v3324_v11 }
 0x1e3   : > { %v4833_v21 = vpop.eup %4832  ;;  %v3626_v63 = vadd.f32 %v3610_v23, %v3594_v44  ;;  %4852 = vrcp.f32 %v3530_v58  ;;  %v3531_v6 = vadd.f32 1.0, %v4831_v15 }
 0x1e4   : > { %v4835_v8 = vpop.eup %4834  ;;  %v3420_v43 = vadd.f32 1.0, %v4833_v21  ;;  %4854 = vpow2.f32 %v4120_v33  ;;  %v4152_v21 = vmul.f32 -1.442695, %v6246_v62 }
 0x1e5   : > { %v4837_v20 = vpop.eup %4836  ;;  %4856 = vtanh.f32 %v3626_v63  ;;  %v3611_v22 = vmul.f32 %v4835_v8, %v4829_v13  ;;  %3674 = vst [vmem:[%s6206_s12 + $0x28] sm:$0xff] %v3626_v63  ;;  %v4122_v8 = vmul.f32 -1.442695, %v6267_v49 }
 0x1e6   : > { %v4839_v26 = vpop.eup %4838  ;;  %4858 = vrcp.f32 %v3420_v43 }
 0x1e7   : > { %v4841_v41 = vpop.eup %4840  ;;  %v3325_v40 = vadd.f32 1.0, %v4839_v26  ;;  %4860 = vpow2.f32 %v4151_v39 }
 0x1e8   : > { %v4843_v23 = vpop.eup %4842  ;;  %v3657_v0 = vmul.f32 %v4841_v41, %v4837_v20  ;;  %4862 = vtanh.f32 %v4246_v48 }
 0x1e9   : > { %v4845_v47 = vpop.eup %4844  ;;  %v3595_v24 = vmul.f32 %v4843_v23, %v6182_v19  ;;  %4864 = vrcp.f32 %v3325_v40  ;;  %v4137_v19 = vmul.f32 -1.442695, %v6260_v1  ;;  %v4153_v23 = vmul.f32 -1.442695, %v6263_v36 }
 0x1ea   : > { %v4847_v4 = vpop.eup %4846  ;;  %3689 = vst [vmem:[%s6273_s16 + $0x20] sm:$0xff] %v3657_v0  ;;  %4866 = vpow2.f32 %v4136_v46  ;;  %v3532_v11 = vadd.f32 1.0, %v4845_v47  ;;  %v4123_v47 = vmul.f32 -1.442695, %v6293_v50 }
 0x1eb   : > { %v4849_v59 = vpop.eup %4848  ;;  %v3627_v58 = vadd.f32 %v3611_v22, %v3595_v24  ;;  %4868 = vrcp.f32 %v3531_v6  ;;  %v3421_v17 = vadd.f32 1.0, %v4847_v4 }
 0x1ec   : > { %v4851_v2 = vpop.eup %4850  ;;  %4870 = vpow2.f32 %v4121_v3 }
 0x1ed   : > { %v4853_v33 = vpop.eup %4852  ;;  %4872 = vtanh.f32 %v3627_v58  ;;  %v3612_v13 = vmul.f32 %v4851_v2, %v4849_v59  ;;  %3675 = vst [vmem:[%s6206_s12 + $0x30] sm:$0xff] %v3627_v58 }
 0x1ee   : > { %v4855_v42 = vpop.eup %4854  ;;  %4874 = vrcp.f32 %v3421_v17 }
 0x1ef   : > { %v4857_v44 = vpop.eup %4856  ;;  %v3326_v15 = vadd.f32 1.0, %v4855_v42  ;;  %4876 = vtanh.f32 %v6236_v38 }
 0x1f0   : > { %v4859_v63 = vpop.eup %4858  ;;  %v3658_v39 = vmul.f32 %v4857_v44, %v4853_v33  ;;  %4878 = vrcp.f32 %v3532_v11  ;;  %v4139_v11 = vmul.f32 -1.442695, %v6301_v45  ;;  %v4124_v44 = vmul.f32 -1.442695, %v6311_v56 }
 0x1f1   : > { %v4861_v43 = vpop.eup %4860  ;;  %v3596_v48 = vmul.f32 %v4859_v63, %v6185_v9  ;;  %4880 = vrcp.f32 %v3326_v15  ;;  %v4138_v9 = vmul.f32 -1.442695, %v6282_v32 }
 0x1f2   : > { %v4863_v20 = vpop.eup %4862  ;;  %3690 = vst [vmem:[%s6273_s16 + $0x28] sm:$0xff] %v3658_v39  ;;  %4882 = vpow2.f32 %v4137_v19  ;;  %v3533_v46 = vadd.f32 1.0, %v4861_v43 }
 0x1f3   : > { %v4865_v1 = vpop.eup %4864  ;;  %v3628_v22 = vadd.f32 %v3612_v13, %v3596_v48  ;;  %4884 = vpow2.f32 %v4152_v21  ;;  %v4154_v13 = vmul.f32 -1.442695, %v6285_v37 }
 0x1f4   : > { %v4867_v26 = vpop.eup %4866  ;;  %v3613_v38 = vmul.f32 %v4865_v1, %v4863_v20  ;;  %4886 = vpow2.f32 %v4122_v8  ;;  %v4140_v20 = vmul.f32 -1.442695, %v6319_v18 }
 0x1f5   : > { %v4869_v62 = vpop.eup %4868  ;;  %4888 = vtanh.f32 %v3628_v22  ;;  %v3422_v41 = vadd.f32 1.0, %v4867_v26  ;;  %3676 = vst [vmem:[%s6206_s12 + $0x38] sm:$0xff] %v3628_v22 }
 0x1f6   : > { %v4871_v49 = vpop.eup %4870  ;;  %4890 = vtanh.f32 %v6257_v29 }
 0x1f7   : > { %v4873_v6 = vpop.eup %4872  ;;  %4892 = vrcp.f32 %v3422_v41  ;;  %v3327_v40 = vadd.f32 1.0, %v4871_v49 }
 0x1f8   : > { %v4875_v0 = vpop.eup %4874  ;;  %v3659_v3 = vmul.f32 %v4873_v6, %v4869_v62  ;;  %4894 = vrcp.f32 %v3533_v46 }
 0x1f9   : > { %v4877_v24 = vpop.eup %4876  ;;  %v3597_v4 = vmul.f32 %v4875_v0, %v6188_v53  ;;  %4896 = vrcp.f32 %v3327_v40 }
 0x1fa   : > { %v4879_v59 = vpop.eup %4878  ;;  %3691 = vst [vmem:[%s6273_s16 + $0x30] sm:$0xff] %v3659_v3  ;;  %4898 = vpow2.f32 %v4138_v9 }
 0x1fb   : > { %v4881_v29 = vpop.eup %4880  ;;  %v3629_v32 = vadd.f32 %v3613_v38, %v3597_v4  ;;  %4900 = vpow2.f32 %v4153_v23  ;;  %v4125_v38 = vmul.f32 -1.442695, %v6329_v27  ;;  %v4141_v27 = vmul.f32 -1.442695, %v6335_v52 }
 0x1fc   : > { %v4883_v58 = vpop.eup %4882  ;;  %v3614_v17 = vmul.f32 %v4881_v29, %v4877_v24  ;;  %4902 = vpow2.f32 %v4123_v47  ;;  %v4126_v24 = vmul.f32 -1.442695, %v6341_v54 }
 0x1fd   : > { %v4885_v36 = vpop.eup %4884  ;;  %4904 = vtanh.f32 %v3629_v32  ;;  %v3423_v2 = vadd.f32 1.0, %v4883_v58  ;;  %3677 = vst [vmem:[%s6206_s12 + $0x40] sm:$0xff] %v3629_v32 }
 0x1fe   : > { %v4887_v50 = vpop.eup %4886  ;;  %v3534_v21 = vadd.f32 1.0, %v4885_v36 }
 0x1ff   : > { %v4889_v33 = vpop.eup %4888  ;;  %4906 = vrcp.f32 %v3423_v2  ;;  %v3328_v53 = vadd.f32 1.0, %v4887_v50  ;;  %v4142_v50 = vmul.f32 -1.442695, %v6352_v51 }
 0x200   : > { %v4891_v42 = vpop.eup %4890  ;;  %v3660_v19 = vmul.f32 %v4889_v33, %v4879_v59  ;;  %4908 = vtanh.f32 %v6278_v55 }
 0x201   : > { %v4893_v15 = vpop.eup %4892  ;;  %4910 = vrcp.f32 %v3328_v53  ;;  %v4157_v53 = vmul.f32 -1.442695, %v6338_v16 }
 0x202   : > { %v4895_v63 = vpop.eup %4894  ;;  %3692 = vst [vmem:[%s6273_s16 + $0x38] sm:$0xff] %v3660_v19  ;;  %v3598_v39 = vmul.f32 %v4893_v15, %v6191_v28  ;;  %4912 = vpow2.f32 %v4139_v11  ;;  %v4155_v28 = vmul.f32 -1.442695, %v6304_v12 }
 0x203   : > { %v4897_v45 = vpop.eup %4896  ;;  %4914 = vpow2.f32 %v4154_v13 }
 0x204   : > { %v4899_v8 = vpop.eup %4898  ;;  %v3630_v43 = vadd.f32 %v3614_v17, %v3598_v39  ;;  %v3615_v37 = vmul.f32 %v4897_v45, %v4891_v42  ;;  %4916 = vpow2.f32 %v4124_v44 }
 0x205   : > { %v4901_v48 = vpop.eup %4900  ;;  %4918 = vrcp.f32 %v3534_v21  ;;  %v3424_v55 = vadd.f32 1.0, %v4899_v8 }
 0x206   : > { %v4903_v56 = vpop.eup %4902  ;;  %4920 = vtanh.f32 %v3630_v43  ;;  %3678 = vst [vmem:[%s6206_s12 + $0x48] sm:$0xff] %v3630_v43  ;;  %v3535_v62 = vadd.f32 1.0, %v4901_v48 }
 0x207   : > { %v4905_v1 = vpop.eup %4904  ;;  %4922 = vrcp.f32 %v3424_v55  ;;  %v3329_v22 = vadd.f32 1.0, %v4903_v56 }
 0x208   : > { %v3661_v26 = vmul.f32 %v4905_v1, %v4895_v63  ;;  %4924 = vtanh.f32 %v6296_v60 }
 0x209   : > { %v4907_v46 = vpop.eup %4906  ;;  %4926 = vrcp.f32 %v3329_v22 }
 0x20a   : > { %v4909_v41 = vpop.eup %4908  ;;  %3693 = vst [vmem:[%s6273_s16 + $0x40] sm:$0xff] %v3661_v26  ;;  %v3599_v49 = vmul.f32 %v4907_v46, %v6194_v10  ;;  %4928 = vpow2.f32 %v4140_v20  ;;  %v4156_v10 = vmul.f32 -1.442695, %v6322_v14 }
 0x20b   : > { %v4911_v18 = vpop.eup %4910  ;;  %4930 = vpow2.f32 %v4155_v28 }
 0x20c   : > { %v4913_v9 = vpop.eup %4912  ;;  %v3631_v6 = vadd.f32 %v3615_v37, %v3599_v49  ;;  %v3616_v40 = vmul.f32 %v4911_v18, %v4909_v41  ;;  %4932 = vpow2.f32 %v4125_v38 }
 0x20d   : > { %v4915_v12 = vpop.eup %4914  ;;  %4934 = vrcp.f32 %v3535_v62  ;;  %v3425_v60 = vadd.f32 1.0, %v4913_v9 }
 0x20e   : > { %v4917_v23 = vpop.eup %4916  ;;  %4936 = vtanh.f32 %v3631_v6  ;;  %3679 = vst [vmem:[%s6206_s12 + $0x50] sm:$0xff] %v3631_v6  ;;  %v3536_v29 = vadd.f32 1.0, %v4915_v12 }
 0x20f   : > { %v4919_v0 = vpop.eup %4918  ;;  %4938 = vrcp.f32 %v3425_v60  ;;  %v3330_v3 = vadd.f32 1.0, %v4917_v23 }
 0x210   : > { %v4921_v47 = vpop.eup %4920  ;;  %4940 = vtanh.f32 %v6316_v61 }
 0x211   : > { %v4923_v4 = vpop.eup %4922  ;;  %v3662_v59 = vmul.f32 %v4921_v47, %v4919_v0  ;;  %4942 = vrcp.f32 %v3330_v3 }
 0x212   : > { %v4925_v32 = vpop.eup %4924  ;;  %v3600_v52 = vmul.f32 %v4923_v4, %v6197_v57  ;;  %4944 = vpow2.f32 %v4141_v27 }
 0x213   : > { %v4927_v58 = vpop.eup %4926  ;;  %3694 = vst [vmem:[%s6273_s16 + $0x48] sm:$0xff] %v3662_v59  ;;  %4946 = vpow2.f32 %v4156_v10 }
 0x214   : > { %v4929_v17 = vpop.eup %4928  ;;  %v3632_v36 = vadd.f32 %v3616_v40, %v3600_v52  ;;  %v3617_v14 = vmul.f32 %v4927_v58, %v4925_v32  ;;  %4948 = vpow2.f32 %v4126_v24 }
 0x215   : > { %v4931_v2 = vpop.eup %4930  ;;  %4950 = vrcp.f32 %v3536_v29  ;;  %v3426_v61 = vadd.f32 1.0, %v4929_v17 }
 0x216   : > { %v4933_v54 = vpop.eup %4932  ;;  %4952 = vtanh.f32 %v3632_v36  ;;  %3680 = vst [vmem:[%s6206_s12 + $0x58] sm:$0xff] %v3632_v36  ;;  %v3537_v19 = vadd.f32 1.0, %v4931_v2 }
 0x217   : > { %v4935_v11 = vpop.eup %4934  ;;  %4954 = vrcp.f32 %v3426_v61  ;;  %v3331_v57 = vadd.f32 1.0, %v4933_v54 }
 0x218   : > { %v4937_v33 = vpop.eup %4936  ;;  %4956 = vtanh.f32 %v6332_v25 }
 0x219   : > { %v4939_v13 = vpop.eup %4938  ;;  %v3663_v42 = vmul.f32 %v4937_v33, %v4935_v11  ;;  %4958 = vrcp.f32 %v3331_v57 }
 0x21a   : > { %v4941_v44 = vpop.eup %4940  ;;  %v3601_v15 = vmul.f32 %v4939_v13, %v6200_v35  ;;  %4960 = vpow2.f32 %v4142_v50  ;;  %v4158_v35 = vmul.f32 -1.442695, %v6355_v30 }
 0x21b   : > { %v4943_v51 = vpop.eup %4942  ;;  %3695 = vst [vmem:[%s6273_s16 + $0x50] sm:$0xff] %v3663_v42  ;;  %4962 = vpow2.f32 %v4157_v53 }
 0x21c   : > { %v4945_v21 = vpop.eup %4944  ;;  %v3633_v63 = vadd.f32 %v3617_v14, %v3601_v15  ;;  %v3618_v39 = vmul.f32 %v4943_v51, %v4941_v44  ;;  %4964 = vrcp.f32 %v3537_v19 }
 0x21d   : > { %v4947_v45 = vpop.eup %4946  ;;  %v3427_v25 = vadd.f32 1.0, %v4945_v21 }
 0x21e   : > { %v4949_v8 = vpop.eup %4948  ;;  %4966 = vtanh.f32 %v3633_v63  ;;  %3681 = vst [vmem:[%s6206_s12 + $0x60] sm:$0xff] %v3633_v63  ;;  %v3538_v56 = vadd.f32 1.0, %v4947_v45 }
 0x21f   : > { %v4951_v16 = vpop.eup %4950  ;;  %4968 = vrcp.f32 %v3427_v25  ;;  %v3332_v43 = vadd.f32 1.0, %v4949_v8 }
 0x220   : > { %v4953_v37 = vpop.eup %4952  ;;  %4970 = vtanh.f32 %v6349_v5 }
 0x221   : > { %v4955_v48 = vpop.eup %4954  ;;  %v3664_v55 = vmul.f32 %v4953_v37, %v4951_v16  ;;  %4972 = vrcp.f32 %v3332_v43 }
 0x222   : > { %v4957_v20 = vpop.eup %4956  ;;  %v3602_v1 = vmul.f32 %v4955_v48, %v6211_v7  ;;  %4974 = vpow2.f32 %v4158_v35 }
 0x223   : > { %v4959_v22 = vpop.eup %4958  ;;  %3696 = vst [vmem:[%s6273_s16 + $0x58] sm:$0xff] %v3664_v55  ;;  %4976 = vrcp.f32 %v3538_v56 }
 0x224   : > { %v4961_v28 = vpop.eup %4960  ;;  %v3634_v26 = vadd.f32 %v3618_v39, %v3602_v1  ;;  %v3619_v38 = vmul.f32 %v4959_v22, %v4957_v20 }
 0x225   : > { %v3428_v46 = vadd.f32 1.0, %v4961_v28  ;;  %v4963_v5 = vpop.eup %4962 }
 0x226   : > { %4978 = vtanh.f32 %v3634_v26  ;;  %3682 = vst [vmem:[%s6206_s12 + $0x68] sm:$0xff] %v3634_v26  ;;  %v4965_v30 = vpop.eup %4964  ;;  %v3539_v18 = vadd.f32 1.0, %v4963_v5 }
 0x227   : > { %4980 = vrcp.f32 %v3428_v46 }
 0x228   : > { %v4967_v62 = vpop.eup %4966  ;;  %4982 = vrcp.f32 %v3539_v18 }
 0x229   : > { %v4969_v41 = vpop.eup %4968  ;;  %v3665_v49 = vmul.f32 %v4967_v62, %v4965_v30 }
 0x22a   : > { %v4971_v7 = vpop.eup %4970  ;;  %v3603_v9 = vmul.f32 %v4969_v41, %v6214_v31 }
 0x22b   : > { %v4973_v6 = vpop.eup %4972  ;;  %3697 = vst [vmem:[%s6273_s16 + $0x60] sm:$0xff] %v3665_v49 }
 0x22c   : > { %v3635_v40 = vadd.f32 %v3619_v38, %v3603_v9  ;;  %v3620_v12 = vmul.f32 %v4973_v6, %v4971_v7  ;;  %v4975_v60 = vpop.eup %4974 }
 0x22d   : > { %v4977_v23 = vpop.eup %4976  ;;  %v3540_v10 = vadd.f32 1.0, %v4975_v60 }
 0x22e   : > { %4984 = vtanh.f32 %v3635_v40  ;;  %3683 = vst [vmem:[%s6206_s12 + $0x70] sm:$0xff] %v3635_v40 }
 0x22f   : > { %4986 = vrcp.f32 %v3540_v10 }
 0x230   : > { %v4979_v27 = vpop.eup %4978 }
 0x231   : > { %v4981_v0 = vpop.eup %4980  ;;  %v3666_v3 = vmul.f32 %v4979_v27, %v4977_v23 }
 0x232   : > { %v3604_v47 = vmul.f32 %v4981_v0, %v6217_v34  ;;  %v4983_v24 = vpop.eup %4982 }
 0x233   : > { %3698 = vst [vmem:[%s6273_s16 + $0x68] sm:$0xff] %v3666_v3 }
 0x234   : > { %v3636_v31 = vadd.f32 %v3620_v12, %v3604_v47 }
 0x236   : > { %4988 = vtanh.f32 %v3636_v31  ;;  %3684 = vst [vmem:[%s6206_s12 + $0x78] sm:$0xff] %v3636_v31 }
 0x238   : > { %v4985_v4 = vpop.eup %4984 }
 0x239   : > { %v3667_v59 = vmul.f32 %v4985_v4, %v4983_v24  ;;  %v4987_v29 = vpop.eup %4986 }
 0x23b   : > { %3699 = vst [vmem:[%s6273_s16 + $0x70] sm:$0xff] %v3667_v59 }
 0x240   : > { %v4989_v32 = vpop.eup %4988 }
 0x241   : > { %v3668_v52 = vmul.f32 %v4989_v32, %v4987_v29 }
 0x243   : > { %3700 = vst [vmem:[%s6273_s16 + $0x78] sm:$0xff] %v3668_v52 }
 0x244 PF: > { %s17_s21 = sadd.s32 1, %s5003_s21  }
 0x245   : > { %p14_p4 = scmp.ge.s32.totalorder %s17_s21, 4  }
 0x247   :  { %16 = sbr.rel (!%p14_p4) target bundleno = 1 (0x1), region = 88 }

</bundles_post_ra>
